<compile_context>
chip_gen: v7x
topology: tpu7x:2x2x1
jax: 0.10.0
libtpu: 0.0.40
codegen_flags: <defaults>
</compile_context>

<pallas_src>
import functools

import jax
import jax.numpy as jnp
from jax import lax
from jax.experimental import pallas as pl
from jax.experimental.pallas import tpu as pltpu

NEG_SLOPE = 0.1  # nn.LeakyReLU negative_slope used by supar's MLP
NEG_INF = float("-inf")


def _leaky_relu(h):
    return jnp.where(h > 0, h, NEG_SLOPE * h)


def _round_up(x, m):
    return ((x + m - 1) // m) * m


def _parser_kernel(
    x_ref,       # (BB, S, D)        concatenated word+feat embeddings (compute dtype)
    mask_ref,    # (BB, 1, S)        1.0 where token is not pad, 0.0 where pad
    w_all_ref,   # (D, Wpad)         fused [arc_d | arc_h | rel_d | rel_h] MLP weight
    b_all_ref,   # (1, Wpad)         fused MLP bias (f32; constant-1 "bias" lanes baked in)
    warc_ref,    # (Ap, Ahp)         arc biaffine weight (bias_x row included)
    wrel_ref,    # (Rp, RT*Rp)       rel biaffine weight tile, label-flattened
    s_arc_ref,   # (BB, S, S)        f32
    s_rel_ref,   # (BB, S, RT, S)    out dtype
    reld_scr,    # (BB, S, Rp)       scratch (compute dtype), persists across label tiles
    relh_scr,    # (BB, S, Rp)       scratch (compute dtype)
):
    BB, S, D = x_ref.shape
    Ap, Ahp = warc_ref.shape
    Rp = wrel_ref.shape[0]
    RT = s_rel_ref.shape[2]
    cdt = x_ref.dtype

    r_tile = pl.program_id(1)

    @pl.when(r_tile == 0)
    def _():
        # ---- fused 4x MLP: one wide matmul + one bias add + one LeakyReLU ----
        # (BB, S, D) -> (BB*S, D): pure leading-dim fold (S multiple of 8) -> free.
        x2 = x_ref[...].reshape(BB * S, D)
        h = jnp.dot(x2, w_all_ref[...], preferred_element_type=jnp.float32)
        h = _leaky_relu(h + b_all_ref[...])                      # f32

        # Lane-aligned segment views (Ap / Ahp / Rp are multiples of 128).
        arc_d = h[:, :Ap].astype(cdt)                            # constant-1 lane at A
        arc_h = h[:, Ap:Ap + Ahp].astype(cdt)
        relд = h[:, Ap + Ahp:Ap + Ahp + Rp].astype(cdt)          # constant-1 lane at R
        relh = h[:, Ap + Ahp + Rp:Ap + Ahp + 2 * Rp].astype(cdt)
        reld_scr[...] = relд.reshape(BB, S, Rp)
        relh_scr[...] = relh.reshape(BB, S, Rp)

        # ---- Arc biaffine: s_arc = [arc_d;1] @ W_arc @ arc_h^T ----
        # bias_x folded via the constant-1 lane baked into arc_d's bias.
        t = jnp.dot(arc_d, warc_ref[...], preferred_element_type=jnp.float32).astype(cdt)
        s_arc = lax.dot_general(
            t.reshape(BB, S, Ahp), arc_h.reshape(BB, S, Ahp),
            dimension_numbers=(((2,), (2,)), ((0,), (0,))),
            preferred_element_type=jnp.float32)                  # (BB, S, S)

        # ---- single fused mask select: pad head columns + diagonal -> -inf ----
        rows = lax.broadcasted_iota(jnp.int32, (S, S), 0)
        cols = lax.broadcasted_iota(jnp.int32, (S, S), 1)
        keep = (mask_ref[...] > 0) & (rows != cols)[None]        # (BB, S, S)
        s_arc_ref[...] = jnp.where(keep, s_arc, NEG_INF).astype(s_arc_ref.dtype)

    # ---- Rel biaffine for this tile of RT labels ----
    # U[b,x, r*Rp + j] = sum_i [rel_d;1][b,x,i] * W[r,i,j]   (bias_x via the 1-lane,
    # bias_y via column j = R of each label block combined with rel_h's 1-lane).
    rel_d2 = reld_scr[...].reshape(BB * S, Rp)
    U = jnp.dot(rel_d2, wrel_ref[...], preferred_element_type=jnp.float32)   # (M, RT*Rp)
    U3 = U.astype(cdt).reshape(BB, S * RT, Rp)        # labels move from lanes to rows
    s_rel = lax.dot_general(
        U3, relh_scr[...],
        dimension_numbers=(((2,), (2,)), ((0,), (0,))),
        preferred_element_type=jnp.float32)                                  # (BB, S*RT, S)
    s_rel_ref[...] = s_rel.reshape(BB, S, RT, S).astype(s_rel_ref.dtype)


def parser_forward(words, feats, params, pad_index=0, block_b=8, seq_align=128,
                   compute_dtype=jnp.bfloat16, out_dtype=None):
    """Returns (s_arc [B,S,S] f32, s_rel [B,S,S,n_rels] out_dtype)."""
    if out_dtype is None:
        out_dtype = compute_dtype
    f32 = jnp.float32

    word_feats = feats[:, :, 0]                                  # [B, S]
    B, S = word_feats.shape

    A = params["w_arc_d"].shape[1]
    R = params["w_rel_d"].shape[1]
    n_rels = params["w_rel_biaf"].shape[0]
    D = params["word_emb"].shape[1] + params["feat_emb"].shape[1]

    cbytes = jnp.dtype(compute_dtype).itemsize
    obytes = jnp.dtype(out_dtype).itemsize

    # ---- block sizing --------------------------------------------------------
    # TODO(synk): bucket batches by length to avoid padding short sentences to 128.
    S_pad = _round_up(S, seq_align)
    # Guarantee >= 2 steps on the "parallel" batch axis when B >= 2 (v7x: 2 TCs/chip).
    BB = max(1, min(block_b, B))
    if B >= 2:
        BB = min(BB, (B + 1) // 2)
    B_pad = _round_up(B, BB)

    # Label tiling: bound the s_rel out block to ~8 MiB per pipeline buffer.
    per_label = BB * S_pad * S_pad * obytes
    max_labels = max(1, (8 * 1024 * 1024) // per_label)
    if n_rels <= max_labels:
        RT, n_rels_pad = n_rels, n_rels                          # single label tile
    else:
        RT = max(8, min(32, (max_labels // 8) * 8))              # multiple of 8 (sublanes)
        n_rels_pad = _round_up(n_rels, RT)

    # Lane-aligned segment widths; constant-1 lanes fold the biaffine bias terms.
    Ap = _round_up(A + 1, 128)   # arc_d  (1-lane at index A -> bias_x)
    Ahp = _round_up(A, 128)      # arc_h
    Rp = _round_up(R + 1, 128)   # rel_d / rel_h (1-lane at index R -> bias_x / bias_y)
    Wpad = Ap + Ahp + 2 * Rp
    # TODO(synk): round segments to 256 on v6e/v7x to fill the 256x256 MXU.

    # ---- glue: padding, masks, embedding lookups (plain JAX) -----------------
    words_p = jnp.pad(words, ((0, B_pad - B), (0, S_pad - S)), constant_values=pad_index)
    wf_p = jnp.pad(word_feats, ((0, B_pad - B), (0, S_pad - S)), constant_values=pad_index)
    # NOTE: the PyTorch Model masks on feats[:, :, 0] != pad_index (word_feats).
    mask = (wf_p != pad_index).astype(f32)[:, None, :]           # (B_pad, 1, S_pad)

    word_embed = jnp.take(params["word_emb"], words_p, axis=0)   # [B_pad, S_pad, n_embed]
    feat_embed = jnp.take(params["feat_emb"], wf_p, axis=0)      # [B_pad, S_pad, n_feat_embed]
    x = jnp.concatenate([word_embed, feat_embed], axis=-1).astype(compute_dtype)

    # ---- fused / padded weights ----------------------------------------------
    def seg(w, b, width, one_lane=None):
        ws = jnp.zeros((D, width), f32).at[:, :w.shape[1]].set(w)
        bs = jnp.zeros((1, width), f32).at[:, :b.shape[1]].set(b)
        if one_lane is not None:
            bs = bs.at[0, one_lane].set(1.0)      # LeakyReLU(1.0) == 1.0 -> constant-1 lane
        return ws, bs

    w0, b0 = seg(params["w_arc_d"], params["b_arc_d"], Ap, one_lane=A)
    w1, b1 = seg(params["w_arc_h"], params["b_arc_h"], Ahp)
    w2, b2 = seg(params["w_rel_d"], params["b_rel_d"], Rp, one_lane=R)
    w3, b3 = seg(params["w_rel_h"], params["b_rel_h"], Rp, one_lane=R)
    w_all = jnp.concatenate([w0, w1, w2, w3], axis=1).astype(compute_dtype)  # (D, Wpad)
    b_all = jnp.concatenate([b0, b1, b2, b3], axis=1)                        # (1, Wpad) f32

    # Arc biaffine: rows 0..A hold W (row A = bias_x row), padded rows/cols zero.
    warc_pad = jnp.zeros((Ap, Ahp), f32).at[:A + 1, :A].set(params["w_arc_biaf"])
    warc_pad = warc_pad.astype(compute_dtype)

    # Rel biaffine flattened: wrel_flat[i, r*Rp + j] = W_rel[r, i, j], i,j in [0, R].
    wrel_pad = jnp.zeros((n_rels_pad, Rp, Rp), f32).at[:n_rels, :R + 1, :R + 1].set(
        params["w_rel_biaf"])
    wrel_flat = jnp.transpose(wrel_pad, (1, 0, 2)).reshape(Rp, n_rels_pad * Rp)
    wrel_flat = wrel_flat.astype(compute_dtype)

    # ---- VMEM budget derived from the actual block set ------------------------
    def _vmem_limit():
        blocks = (BB * S_pad * D * cbytes            # x
                  + BB * S_pad * 4                   # mask
                  + D * Wpad * cbytes                # fused MLP weight
                  + Wpad * 4                         # fused MLP bias
                  + Ap * Ahp * cbytes                # arc biaffine
                  + Rp * RT * Rp * cbytes            # rel biaffine tile
                  + BB * S_pad * S_pad * 4           # s_arc out block
                  + BB * S_pad * RT * S_pad * obytes)  # s_rel out block
        scratch = 2 * BB * S_pad * Rp * cbytes
        temps = (BB * S_pad * Wpad * 4               # h (f32)
                 + 2 * BB * S_pad * RT * Rp * 4      # U + relayout copy
                 + BB * S_pad * RT * S_pad * 4       # s_rel f32 accumulator
                 + 2 * BB * S_pad * S_pad * 4)       # s_arc f32 accumulator + mask temps
        est = 2 * blocks + scratch + temps           # 2x: double-buffered pipeline
        try:
            phys = getattr(pltpu.get_tpu_info(), "vmem_capacity_bytes", 64 * 1024 * 1024)
        except Exception:  # pragma: no cover - defensive fallback
            phys = 64 * 1024 * 1024
        return int(min(max(est + est // 2, 32 * 1024 * 1024), (phys * 85) // 100))

    num_b = B_pad // BB
    num_r = n_rels_pad // RT

    grid_spec = pltpu.PrefetchScalarGridSpec(
        num_scalar_prefetch=0,
        grid=(num_b, num_r),                          # label tiles innermost
        in_specs=[
            pl.BlockSpec((BB, S_pad, D), lambda b, r: (b, 0, 0)),        # x
            pl.BlockSpec((BB, 1, S_pad), lambda b, r: (b, 0, 0)),        # mask
            pl.BlockSpec((D, Wpad), lambda b, r: (0, 0)),                # fused MLP weight
            pl.BlockSpec((1, Wpad), lambda b, r: (0, 0)),                # fused MLP bias
            pl.BlockSpec((Ap, Ahp), lambda b, r: (0, 0)),                # arc biaffine
            pl.BlockSpec((Rp, RT * Rp), lambda b, r: (0, r)),            # rel biaffine tile
        ],
        out_specs=(
            pl.BlockSpec((BB, S_pad, S_pad), lambda b, r: (b, 0, 0)),         # s_arc
            pl.BlockSpec((BB, S_pad, RT, S_pad), lambda b, r: (b, 0, r, 0)),  # s_rel
        ),
        scratch_shapes=[
            pltpu.VMEM((BB, S_pad, Rp), compute_dtype),   # rel_d (persists across tiles)
            pltpu.VMEM((BB, S_pad, Rp), compute_dtype),   # rel_h
        ],
    )

    s_arc_p, s_rel_p = pl.pallas_call(
        _parser_kernel,
        grid_spec=grid_spec,
        out_shape=(
            jax.ShapeDtypeStruct((B_pad, S_pad, S_pad), jnp.float32),
            jax.ShapeDtypeStruct((B_pad, S_pad, n_rels_pad, S_pad), out_dtype),
        ),
        compiler_params=pltpu.CompilerParams(
            dimension_semantics=("parallel", "arbitrary"),
            vmem_limit_bytes=_vmem_limit()),
    )(x, mask, w_all, b_all, warc_pad, wrel_flat)

    s_arc = s_arc_p[:B, :S, :S]
    # [B, S, n_rels, S] -> [B, S, S, n_rels]: only the minor-two-dim swap remains.
    # TODO(synk): keep label-major output and fuse the label gather/argmax into the
    # downstream decoder to eliminate this lane-sparse relayout entirely.
    s_rel = jnp.transpose(s_rel_p[:B, :S, :n_rels, :S], (0, 1, 3, 2))
    return s_arc, s_rel


def _reference_forward(words, feats, params, pad_index=0):
    """Pure-JAX reference mirroring the PyTorch eval-mode forward."""
    word_feats = feats[:, :, 0]
    mask = word_feats != pad_index
    we = jnp.take(params["word_emb"], words, axis=0)
    fe = jnp.take(params["feat_emb"], word_feats, axis=0)
    x = jnp.concatenate([we, fe], axis=-1)

    def mlp(x, w, b):
        h = x @ w + b[0]
        return jnp.where(h > 0, h, NEG_SLOPE * h)

    arc_d = mlp(x, params["w_arc_d"], params["b_arc_d"])
    arc_h = mlp(x, params["w_arc_h"], params["b_arc_h"])
    rel_d = mlp(x, params["w_rel_d"], params["b_rel_d"])
    rel_h = mlp(x, params["w_rel_h"], params["b_rel_h"])

    B, S, A = arc_d.shape
    ones = jnp.ones((B, S, 1), jnp.float32)
    arc_d_b = jnp.concatenate([arc_d, ones], -1)
    s_arc = jnp.einsum("bxi,ij,byj->bxy", arc_d_b, params["w_arc_biaf"], arc_h)

    rel_d_b = jnp.concatenate([rel_d, ones], -1)
    rel_h_b = jnp.concatenate([rel_h, ones], -1)
    s_rel = jnp.einsum("bxi,oij,byj->boxy", rel_d_b, params["w_rel_biaf"], rel_h_b)
    s_rel = jnp.transpose(s_rel, (0, 2, 3, 1))

    s_arc = jnp.where(mask[:, None, :], s_arc, NEG_INF)
    eye = jnp.eye(S, dtype=bool)
    s_arc = jnp.where(eye[None], NEG_INF, s_arc)
    return s_arc, s_rel


if __name__ == "__main__":
    # Small shapes
    B, S, FIX = 2, 8, 3
    n_words, n_feats = 100, 50
    n_embed, n_feat_embed = 16, 16
    n_mlp_arc, n_mlp_rel, n_rels = 32, 16, 4
    pad_index = 0
    D = n_embed + n_feat_embed

    key = jax.random.PRNGKey(0)
    ks = jax.random.split(key, 16)

    params = {
        "word_emb": 0.1 * jax.random.normal(ks[0], (n_words, n_embed), jnp.float32),
        "feat_emb": 0.1 * jax.random.normal(ks[1], (n_feats, n_feat_embed), jnp.float32),
        "w_arc_d": 0.1 * jax.random.normal(ks[2], (D, n_mlp_arc), jnp.float32),
        "b_arc_d": 0.1 * jax.random.normal(ks[3], (1, n_mlp_arc), jnp.float32),
        "w_arc_h": 0.1 * jax.random.normal(ks[4], (D, n_mlp_arc), jnp.float32),
        "b_arc_h": 0.1 * jax.random.normal(ks[5], (1, n_mlp_arc), jnp.float32),
        "w_rel_d": 0.1 * jax.random.normal(ks[6], (D, n_mlp_rel), jnp.float32),
        "b_rel_d": 0.1 * jax.random.normal(ks[7], (1, n_mlp_rel), jnp.float32),
        "w_rel_h": 0.1 * jax.random.normal(ks[8], (D, n_mlp_rel), jnp.float32),
        "b_rel_h": 0.1 * jax.random.normal(ks[9], (1, n_mlp_rel), jnp.float32),
        # Biaffine weights: arc -> [A+1, A] (bias_x only), rel -> [n_rels, R+1, R+1]
        "w_arc_biaf": 0.1 * jax.random.normal(ks[10], (n_mlp_arc + 1, n_mlp_arc), jnp.float32),
        "w_rel_biaf": 0.1 * jax.random.normal(
            ks[11], (n_rels, n_mlp_rel + 1, n_mlp_rel + 1), jnp.float32),
    }

    words = jax.random.randint(ks[12], (B, S), 1, n_words, dtype=jnp.int32)
    feats = jax.random.randint(ks[13], (B, S, FIX), 1, n_feats, dtype=jnp.int32)
    # introduce some padding in the second sequence to exercise the mask
    feats = feats.at[1, S - 2:, 0].set(pad_index)

    ref_arc, ref_rel = _reference_forward(words, feats, params, pad_index)
    finite = jnp.isfinite(ref_arc)

    # --- strict check: f32 compute path ---
    s_arc, s_rel = jax.jit(functools.partial(
        parser_forward, pad_index=pad_index, compute_dtype=jnp.float32))(words, feats, params)
    jax.block_until_ready((s_arc, s_rel))
    assert s_arc.shape == (B, S, S) and s_rel.shape == (B, S, S, n_rels)
    assert bool(jnp.all(jnp.isfinite(s_arc) == finite))
    assert bool(jnp.allclose(jnp.where(finite, s_arc, 0.0),
                             jnp.where(finite, ref_arc, 0.0), atol=1e-4, rtol=1e-4))
    assert bool(jnp.allclose(s_rel, ref_rel, atol=1e-4, rtol=1e-4))

    # --- fast path (production default): bf16 activations, f32 accumulation ---
    s_arc_bf, s_rel_bf = jax.jit(functools.partial(
        parser_forward, pad_index=pad_index, compute_dtype=jnp.bfloat16))(words, feats, params)
    jax.block_until_ready((s_arc_bf, s_rel_bf))
    assert s_arc_bf.shape == (B, S, S) and s_rel_bf.shape == (B, S, S, n_rels)
    assert bool(jnp.all(jnp.isfinite(s_arc_bf) == finite))
    assert bool(jnp.allclose(jnp.where(finite, s_arc_bf, 0.0),
                             jnp.where(finite, ref_arc, 0.0), atol=5e-2, rtol=5e-2))
    assert bool(jnp.allclose(s_rel_bf.astype(jnp.float32), ref_rel, atol=5e-2, rtol=5e-2))

    print("KERNEL_OK")
</pallas_src>

<mosaic_0001>
module attributes {stable_mosaic.version = 11 : i64} {
  func.func @_parser_kernel(%arg0: i32, %arg1: i32, %arg2: memref<1x128x32xf32, #tpu.memory_space<vmem>>, %arg3: memref<1x1x128xf32, #tpu.memory_space<vmem>>, %arg4: memref<32x512xf32, #tpu.memory_space<vmem>>, %arg5: memref<1x512xf32, #tpu.memory_space<vmem>>, %arg6: memref<128x128xf32, #tpu.memory_space<vmem>>, %arg7: memref<128x512xf32, #tpu.memory_space<vmem>>, %arg8: memref<1x128x128xf32, #tpu.memory_space<vmem>>, %arg9: memref<1x128x4x128xf32, #tpu.memory_space<vmem>>, %arg10: memref<1x128x128xf32, #tpu.memory_space<vmem>>, %arg11: memref<1x128x128xf32, #tpu.memory_space<vmem>>) attributes {dimension_semantics = [#tpu.dimension_semantics<parallel>, #tpu.dimension_semantics<arbitrary>], iteration_bounds = array<i64: 2, 1>, scalar_prefetch = 0 : i64, scratch_operands = 2 : i64, tpu.core_type = #tpu.core_type<tc>, window_params = [{transform_indices = @transform_0, window_bounds = array<i64: 1, 128, 32>}, {transform_indices = @transform_1, window_bounds = array<i64: 1, 1, 128>}, {pipeline_mode = #tpu.pipeline_mode<synchronous>, transform_indices = @transform_2, window_bounds = array<i64: 32, 512>}, {pipeline_mode = #tpu.pipeline_mode<synchronous>, transform_indices = @transform_3, window_bounds = array<i64: 1, 512>}, {pipeline_mode = #tpu.pipeline_mode<synchronous>, transform_indices = @transform_4, window_bounds = array<i64: 128, 128>}, {transform_indices = @transform_5, window_bounds = array<i64: 128, 512>}, {transform_indices = @transform_6, window_bounds = array<i64: 1, 128, 128>}, {transform_indices = @transform_7, window_bounds = array<i64: 1, 128, 4, 128>}]} {
    %c0_i32 = arith.constant 0 : i32
    %0 = arith.cmpi eq, %arg1, %c0_i32 : i32
    %1 = arith.extui %0 : i1 to i32
    %c0_i32_0 = arith.constant 0 : i32
    %2 = arith.cmpi ne, %1, %c0_i32_0 : i32
    scf.if %2 {
      %c0_13 = arith.constant 0 : index
      %c0_14 = arith.constant 0 : index
      %c0_15 = arith.constant 0 : index
      %12 = vector.load %arg2[%c0_13, %c0_14, %c0_15] : memref<1x128x32xf32, #tpu.memory_space<vmem>>, vector<1x128x32xf32>
      %13 = vector.shape_cast %12 : vector<1x128x32xf32> to vector<128x32xf32>
      %c0_16 = arith.constant 0 : index
      %c0_17 = arith.constant 0 : index
      %14 = vector.load %arg4[%c0_16, %c0_17] : memref<32x512xf32, #tpu.memory_space<vmem>>, vector<32x512xf32>
      %cst_18 = arith.constant dense<0.000000e+00> : vector<128x512xf32>
      %15 = tpu.matmul %13, %14, %cst_18 {dimension_numbers = #tpu.dot_dimension_numbers<[1], [0], [0], [1], [0, 0, 1, 1], [], []>} : vector<128x32xf32>, vector<32x512xf32>, vector<128x512xf32> -> vector<128x512xf32>
      %c0_19 = arith.constant 0 : index
      %c0_20 = arith.constant 0 : index
      %16 = vector.load %arg5[%c0_19, %c0_20] : memref<1x512xf32, #tpu.memory_space<vmem>>, vector<1x512xf32>
      %17 = vector.broadcast %16 : vector<1x512xf32> to vector<128x512xf32>
      %18 = arith.addf %15, %17 : vector<128x512xf32>
      %cst_21 = arith.constant 0.000000e+00 : f32
      %19 = vector.broadcast %cst_21 : f32 to vector<128x512xf32>
      %20 = arith.cmpf ogt, %18, %19 : vector<128x512xf32>
      %cst_22 = arith.constant 1.000000e-01 : f32
      %21 = vector.broadcast %cst_22 : f32 to vector<128x512xf32>
      %22 = arith.mulf %21, %18 : vector<128x512xf32>
      %23 = arith.select %20, %18, %22 : vector<128x512xi1>, vector<128x512xf32>
      %24 = vector.extract_strided_slice %23 {offsets = [0, 0], sizes = [128, 128], strides = [1, 1]} : vector<128x512xf32> to vector<128x128xf32>
      %25 = vector.extract_strided_slice %23 {offsets = [0, 128], sizes = [128, 128], strides = [1, 1]} : vector<128x512xf32> to vector<128x128xf32>
      %26 = vector.extract_strided_slice %23 {offsets = [0, 256], sizes = [128, 128], strides = [1, 1]} : vector<128x512xf32> to vector<128x128xf32>
      %27 = vector.extract_strided_slice %23 {offsets = [0, 384], sizes = [128, 128], strides = [1, 1]} : vector<128x512xf32> to vector<128x128xf32>
      %28 = vector.shape_cast %26 : vector<128x128xf32> to vector<1x128x128xf32>
      %c0_23 = arith.constant 0 : index
      %c0_24 = arith.constant 0 : index
      %c0_25 = arith.constant 0 : index
      %29 = vector.load %arg10[%c0_23, %c0_24, %c0_25] : memref<1x128x128xf32, #tpu.memory_space<vmem>>, vector<1x128x128xf32>
      tpu.vector_store %arg10[%c0_23, %c0_24, %c0_25], %28 {strides = array<i32>} : memref<1x128x128xf32, #tpu.memory_space<vmem>>, vector<1x128x128xf32>,
      %30 = vector.shape_cast %27 : vector<128x128xf32> to vector<1x128x128xf32>
      %c0_26 = arith.constant 0 : index
      %c0_27 = arith.constant 0 : index
      %c0_28 = arith.constant 0 : index
      %31 = vector.load %arg11[%c0_26, %c0_27, %c0_28] : memref<1x128x128xf32, #tpu.memory_space<vmem>>, vector<1x128x128xf32>
      tpu.vector_store %arg11[%c0_26, %c0_27, %c0_28], %30 {strides = array<i32>} : memref<1x128x128xf32, #tpu.memory_space<vmem>>, vector<1x128x128xf32>,
      %c0_29 = arith.constant 0 : index
      %c0_30 = arith.constant 0 : index
      %32 = vector.load %arg6[%c0_29, %c0_30] : memref<128x128xf32, #tpu.memory_space<vmem>>, vector<128x128xf32>
      %cst_31 = arith.constant dense<0.000000e+00> : vector<128x128xf32>
      %33 = tpu.matmul %24, %32, %cst_31 {dimension_numbers = #tpu.dot_dimension_numbers<[1], [0], [0], [1], [0, 0, 1, 1], [], []>} : vector<128x128xf32>, vector<128x128xf32>, vector<128x128xf32> -> vector<128x128xf32>
      %34 = vector.shape_cast %33 : vector<128x128xf32> to vector<1x128x128xf32>
      %35 = vector.shape_cast %25 : vector<128x128xf32> to vector<1x128x128xf32>
      %cst_32 = arith.constant dense<0.000000e+00> : vector<1x128x128xf32>
      %36 = tpu.matmul %34, %35, %cst_32 {dimension_numbers = #tpu.dot_dimension_numbers<[2], [2], [1], [1], [0, 0, 0, 1, 1, 1], [0], [0]>} : vector<1x128x128xf32>, vector<1x128x128xf32>, vector<1x128x128xf32> -> vector<1x128x128xf32>
      %37 = tpu.iota {dimensions = array<i32: 0>} : vector<128x128xi32>
      %38 = tpu.iota {dimensions = array<i32: 1>} : vector<128x128xi32>
      %c0_33 = arith.constant 0 : index
      %c0_34 = arith.constant 0 : index
      %c0_35 = arith.constant 0 : index
      %39 = vector.load %arg3[%c0_33, %c0_34, %c0_35] : memref<1x1x128xf32, #tpu.memory_space<vmem>>, vector<1x1x128xf32>
      %cst_36 = arith.constant 0.000000e+00 : f32
      %40 = vector.broadcast %cst_36 : f32 to vector<1x1x128xf32>
      %41 = arith.cmpf ogt, %39, %40 : vector<1x1x128xf32>
      %42 = arith.cmpi ne, %37, %38 : vector<128x128xi32>
      %43 = vector.shape_cast %42 : vector<128x128xi1> to vector<1x128x128xi1>
      %44 = vector.broadcast %41 : vector<1x1x128xi1> to vector<1x128x128xi1>
      %45 = arith.andi %44, %43 : vector<1x128x128xi1>
      %cst_37 = arith.constant 0xFF800000 : f32
      %46 = vector.broadcast %cst_37 : f32 to vector<1x128x128xf32>
      %47 = arith.select %45, %36, %46 : vector<1x128x128xi1>, vector<1x128x128xf32>
      %c0_38 = arith.constant 0 : index
      %c0_39 = arith.constant 0 : index
      %c0_40 = arith.constant 0 : index
      %48 = vector.load %arg8[%c0_38, %c0_39, %c0_40] : memref<1x128x128xf32, #tpu.memory_space<vmem>>, vector<1x128x128xf32>
      tpu.vector_store %arg8[%c0_38, %c0_39, %c0_40], %47 {strides = array<i32>} : memref<1x128x128xf32, #tpu.memory_space<vmem>>, vector<1x128x128xf32>,
    } else {
    }
    %c0 = arith.constant 0 : index
    %c0_1 = arith.constant 0 : index
    %c0_2 = arith.constant 0 : index
    %3 = vector.load %arg10[%c0, %c0_1, %c0_2] : memref<1x128x128xf32, #tpu.memory_space<vmem>>, vector<1x128x128xf32>
    %4 = vector.shape_cast %3 : vector<1x128x128xf32> to vector<128x128xf32>
    %c0_3 = arith.constant 0 : index
    %c0_4 = arith.constant 0 : index
    %5 = vector.load %arg7[%c0_3, %c0_4] : memref<128x512xf32, #tpu.memory_space<vmem>>, vector<128x512xf32>
    %cst = arith.constant dense<0.000000e+00> : vector<128x512xf32>
    %6 = tpu.matmul %4, %5, %cst {dimension_numbers = #tpu.dot_dimension_numbers<[1], [0], [0], [1], [0, 0, 1, 1], [], []>} : vector<128x128xf32>, vector<128x512xf32>, vector<128x512xf32> -> vector<128x512xf32>
    %7 = vector.shape_cast %6 : vector<128x512xf32> to vector<1x512x128xf32>
    %c0_5 = arith.constant 0 : index
    %c0_6 = arith.constant 0 : index
    %c0_7 = arith.constant 0 : index
    %8 = vector.load %arg11[%c0_5, %c0_6, %c0_7] : memref<1x128x128xf32, #tpu.memory_space<vmem>>, vector<1x128x128xf32>
    %cst_8 = arith.constant dense<0.000000e+00> : vector<1x512x128xf32>
    %9 = tpu.matmul %7, %8, %cst_8 {dimension_numbers = #tpu.dot_dimension_numbers<[2], [2], [1], [1], [0, 0, 0, 1, 1, 1], [0], [0]>} : vector<1x512x128xf32>, vector<1x128x128xf32>, vector<1x512x128xf32> -> vector<1x512x128xf32>
    %10 = vector.shape_cast %9 : vector<1x512x128xf32> to vector<1x128x4x128xf32>
    %c0_9 = arith.constant 0 : index
    %c0_10 = arith.constant 0 : index
    %c0_11 = arith.constant 0 : index
    %c0_12 = arith.constant 0 : index
    %11 = vector.load %arg9[%c0_9, %c0_10, %c0_11, %c0_12] : memref<1x128x4x128xf32, #tpu.memory_space<vmem>>, vector<1x128x4x128xf32>
    tpu.vector_store %arg9[%c0_9, %c0_10, %c0_11, %c0_12], %10 {strides = array<i32>} : memref<1x128x4x128xf32, #tpu.memory_space<vmem>>, vector<1x128x4x128xf32>,
    return
  }
  func.func @transform_0(%arg0: i32, %arg1: i32) -> (i32, i32, i32) {
    %c0_i32 = arith.constant 0 : i32
    %c0_i32_0 = arith.constant 0 : i32
    %c0_i32_1 = arith.constant 0 : i32
    return %arg0, %c0_i32, %c0_i32_0 : i32, i32, i32
  }
  func.func @transform_1(%arg0: i32, %arg1: i32) -> (i32, i32, i32) {
    %c0_i32 = arith.constant 0 : i32
    %c0_i32_0 = arith.constant 0 : i32
    %c0_i32_1 = arith.constant 0 : i32
    return %arg0, %c0_i32, %c0_i32_0 : i32, i32, i32
  }
  func.func @transform_2(%arg0: i32, %arg1: i32) -> (i32, i32) {
    %c0_i32 = arith.constant 0 : i32
    %c0_i32_0 = arith.constant 0 : i32
    %c0_i32_1 = arith.constant 0 : i32
    return %c0_i32, %c0_i32_0 : i32, i32
  }
  func.func @transform_3(%arg0: i32, %arg1: i32) -> (i32, i32) {
    %c0_i32 = arith.constant 0 : i32
    %c0_i32_0 = arith.constant 0 : i32
    %c0_i32_1 = arith.constant 0 : i32
    return %c0_i32, %c0_i32_0 : i32, i32
  }
  func.func @transform_4(%arg0: i32, %arg1: i32) -> (i32, i32) {
    %c0_i32 = arith.constant 0 : i32
    %c0_i32_0 = arith.constant 0 : i32
    %c0_i32_1 = arith.constant 0 : i32
    return %c0_i32, %c0_i32_0 : i32, i32
  }
  func.func @transform_5(%arg0: i32, %arg1: i32) -> (i32, i32) {
    %c0_i32 = arith.constant 0 : i32
    %c0_i32_0 = arith.constant 0 : i32
    return %c0_i32, %arg1 : i32, i32
  }
  func.func @transform_6(%arg0: i32, %arg1: i32) -> (i32, i32, i32) {
    %c0_i32 = arith.constant 0 : i32
    %c0_i32_0 = arith.constant 0 : i32
    %c0_i32_1 = arith.constant 0 : i32
    return %arg0, %c0_i32, %c0_i32_0 : i32, i32, i32
  }
  func.func @transform_7(%arg0: i32, %arg1: i32) -> (i32, i32, i32, i32) {
    %c0_i32 = arith.constant 0 : i32
    %c0_i32_0 = arith.constant 0 : i32
    %c0_i32_1 = arith.constant 0 : i32
    return %arg0, %c0_i32, %arg1, %c0_i32_0 : i32, i32, i32, i32
  }
}

</mosaic_0001>

<bundles_post_ra>
// kernel: parser_forward.1
= control target key start
LH: loop header
LB: loop body
LE: loop exit
PB: predicated region body
PF: predicated region fallthrough
CT: control target
= control target key end

     0   :  { %s4529_s24 = smov 0   ;;  %s4531_s25 = smov 0   ;;  %s6028_s0 = inlined_call_operand.vmem [shape: f32[2,128,32], index: 0, kind: input, shape index: {}]   ;;  %s6029_s1 = inlined_call_operand.vmem [shape: f32[2,1,128], index: 1, kind: input, shape index: {}]   ;;  %s6030_s2 = inlined_call_operand.vmem [shape: f32[32,512], index: 2, kind: input, shape index: {}]   ;;  %s6031_s3 = inlined_call_operand.vmem [shape: f32[1,512], index: 3, kind: input, shape index: {}]   ;;  %s6032_s4 = inlined_call_operand.vmem [shape: f32[128,128], index: 4, kind: input, shape index: {}]   ;;  %s6033_s5 = inlined_call_operand.vmem [shape: f32[128,512], index: 5, kind: input, shape index: {}]   ;;  %s6034_s6 = inlined_call_operand.vmem [shape: f32[2,128,128], index: 6, kind: output, shape index: {0}]   ;;  %s6035_s7 = inlined_call_operand.vmem [shape: f32[2,128,4,128], index: 7, kind: output, shape index: {1}]  }
   0x1   :  { %s4533_s26 = smov 0  }
   0x2 LB: > { %s30_s27 = sadd.s32 1, %s4479_s25  ;;  %p3813_p0 = scmp.ge.s32.totalorder %s4483_s26, 1  ;;  %s4483_s26 = sphi %s4533_s26, %s18_s26   ;;  %s4479_s25 = sphi %s4531_s25, %s6060_s25   ;;  %s4475_s24 = sphi %s4529_s24, %s6059_s24  }
   0x3   : > { %p32_p1 = scmp.ge.s32.totalorder %s30_s27, 2  ;;  %p273_p2 = scmp.lt.s32.totalorder %s4483_s26, 3 }
   0x5   : > { %s6062_s27 = smov (%p32_p1, %s30_s27), 0  ;;  %p274_p3 = pnand %p3813_p0, %p273_p2 }
   0x6   : > { %v369_v0 = vld [vmem:[%s6030_s2 + $0x8] sm:$0xff] (!%p274_p3)  ;;  %v368_v2 = vld [vmem:[%s6030_s2] sm:$0xff] (!%p274_p3)  ;;  %p321_p4 = scmp.lt.s32.totalorder (!%p274_p3), %s4475_s24, 1  ;;  %v4485_v7 = vmov (!%p274_p3), 0.0   ;;  %v1003_v16 = vld [vmem:[%s6032_s4 + $0x10] sm:$0xff] (!%p274_p3)  ;;  %vm406_vm0 = vcmask (!%p274_p3), 261120  }
   0x7   : > { %277 = sbr.rel (%p274_p3) target bundleno = 1044 (0x414), region = 44  ;;  %v373_v1 = vld [vmem:[%s6030_s2 + $0x28] sm:$0xff] (!%p274_p3)  ;;  %v372_v4 = vld [vmem:[%s6030_s2 + $0x20] sm:$0xff] (!%p274_p3)  ;;  %519 = vmatprep.mubr.f32.mxu0 (!%p274_p3), %v4485_v7  ;;  %680 = vmatprep.mubr.f32.mxu1 (!%p274_p3), %v4485_v7  ;;  %v1004_v17 = vld [vmem:[%s6032_s4 + $0x18] sm:$0xff] (!%p274_p3) }
   0x8   : > { %v4241_v3 = vpack.c.bf16 (!%p274_p3), %v373_v1, %v369_v0  ;;  %v377_v5 = vld [vmem:[%s6030_s2 + $0x48] sm:$0xff] (!%p274_p3)  ;;  %v4243_v8 = vpack.c.bf16 (!%p274_p3), %v372_v4, %v368_v2  ;;  %v376_v10 = vld [vmem:[%s6030_s2 + $0x40] sm:$0xff] (!%p274_p3)  ;;  %v4261_v19 = vpack.c.bf16 (!%p274_p3), %v1004_v17, %v1003_v16  ;;  %v1007_v24 = vld [vmem:[%s6032_s4 + $0x30] sm:$0xff] (!%p274_p3)  ;;  %v386_v1 = vlaneseq (!%p274_p3) }
   0x9   : > { %v381_v6 = vld [vmem:[%s6030_s2 + $0x68] sm:$0xff] (!%p274_p3)  ;;  %v380_v11 = vld [vmem:[%s6030_s2 + $0x60] sm:$0xff] (!%p274_p3)  ;;  %v1008_v25 = vld [vmem:[%s6032_s4 + $0x38] sm:$0xff] (!%p274_p3) }
   0xa   : > { %v4245_v9 = vpack.c.bf16 (!%p274_p3), %v381_v6, %v377_v5  ;;  %v1001_v12 = vld [vmem:[%s6032_s4] sm:$0xff] (!%p274_p3)  ;;  %4242 = vmatprep.subr.bf16.mxu0 (!%p274_p3), %v4241_v3  ;;  %v1002_v13 = vld [vmem:[%s6032_s4 + $0x8] sm:$0xff] (!%p274_p3)  ;;  %v4247_v14 = vpack.c.bf16 (!%p274_p3), %v380_v11, %v376_v10  ;;  %v4269_v27 = vpack.c.bf16 (!%p274_p3), %v1008_v25, %v1007_v24  ;;  %v1011_v32 = vld [vmem:[%s6032_s4 + $0x50] sm:$0xff] (!%p274_p3)  ;;  %v4778_v2 = vshrl.u32 (!%p274_p3), %v386_v1, 7 }
   0xb   : > { %4244 = vmatpush1.bf16.msra.mxu0 (!%p274_p3), %v4243_v8  ;;  %v4257_v15 = vpack.c.bf16 (!%p274_p3), %v1002_v13, %v1001_v12  ;;  %v1005_v20 = vld [vmem:[%s6032_s4 + $0x20] sm:$0xff] (!%p274_p3)  ;;  %v1006_v21 = vld [vmem:[%s6032_s4 + $0x28] sm:$0xff] (!%p274_p3)  ;;  %v1012_v33 = vld [vmem:[%s6032_s4 + $0x58] sm:$0xff] (!%p274_p3) }
   0xc   : > { %4246 = vmatprep.subr.bf16.mxu0 (!%p274_p3), %v4245_v9  ;;  %v4265_v23 = vpack.c.bf16 (!%p274_p3), %v1006_v21, %v1005_v20  ;;  %v1009_v28 = vld [vmem:[%s6032_s4 + $0x40] sm:$0xff] (!%p274_p3)  ;;  %v1010_v29 = vld [vmem:[%s6032_s4 + $0x48] sm:$0xff] (!%p274_p3)  ;;  %v4277_v35 = vpack.c.bf16 (!%p274_p3), %v1012_v33, %v1011_v32  ;;  %v371_v47 = vld [vmem:[%s6030_s2 + $0x18] sm:$0xff] (!%p274_p3)  ;;  %v388_v3 = vsub.s32 (!%p274_p3), 0, %v4778_v2  ;;  %v392_v5 = vsub.s32 (!%p274_p3), 1, %v4778_v2 }
   0xd   : > { %v4273_v31 = vpack.c.bf16 (!%p274_p3), %v1010_v29, %v1009_v28  ;;  %v375_v48 = vld [vmem:[%s6030_s2 + $0x38] sm:$0xff] (!%p274_p3)  ;;  %v370_v50 = vld [vmem:[%s6030_s2 + $0x10] sm:$0xff] (!%p274_p3)  ;;  %v1013_v53 = vld [vmem:[%s6032_s4 + $0x60] sm:$0xff] (!%p274_p3) }
   0xe   : > { %s6064_s24 = smov (!%p321_p4, %s4475_s24), 1  ;;  %v4249_v49 = vpack.c.bf16 %v375_v48, %v371_v47  ;;  %v374_v51 = vld [vmem:[%s6030_s2 + $0x30] sm:$0xff]  ;;  %v1014_v54 = vld [vmem:[%s6032_s4 + $0x68] sm:$0xff]  ;;  %v379_v56 = vld [vmem:[%s6030_s2 + $0x58] sm:$0xff] }
   0xf   : > { %s3854_s29 = sshll.u32 %s6064_s24, 7  ;;  %4248 = vmatpush1.bf16.msra.mxu0 %v4247_v14  ;;  %v4251_v52 = vpack.c.bf16 %v374_v51, %v370_v50  ;;  %v4281_v55 = vpack.c.bf16 %v1014_v54, %v1013_v53  ;;  %v383_v57 = vld [vmem:[%s6030_s2 + $0x78] sm:$0xff]  ;;  %v378_v59 = vld [vmem:[%s6030_s2 + $0x50] sm:$0xff]  ;;  %v4784_v4 = vld [vmem:[%s6031_s3] sm:$0xf]  ;;  %s328_s28 = scalar_lea.vmem %s6029_s1, %s6064_s24 }
  0x10   : > { %s4587_s9 = scalar_lea.vmem %s6028_s0, %s3854_s29  ;;  %4258 = vmatprep.subr.bf16.mxu0 %v4257_v15  ;;  %4250 = vmatprep.subr.bf16.mxu1 %v4249_v49  ;;  %v4253_v58 = vpack.c.bf16 %v383_v57, %v379_v56  ;;  %v382_v60 = vld [vmem:[%s6030_s2 + $0x70] sm:$0xff]  ;;  %v1016_v63 = vld [vmem:[%s6032_s4 + $0x78] sm:$0xff]  ;;  %v4790_v6 = vrot.slane %v4784_v4, %v388_v3  ;;  %v4793_v8 = vrot.slane %v4784_v4, %v392_v5  ;;  %s5330_s10 = scalar_lea.vmem %s6034_s6, %s3854_s29 }
  0x11   : > { %v4596_v18 = vld [vmem:[%s4587_s9] sm:$0xff]  ;;  %v4608_v22 = vld [vmem:[%s4587_s9 + $0x8] sm:$0xff]  ;;  %v4620_v26 = vld [vmem:[%s4587_s9 + $0x10] sm:$0xff]  ;;  %4252 = vmatpush1.bf16.msra.mxu1 %v4251_v52  ;;  %v4255_v61 = vpack.c.bf16 %v382_v60, %v378_v59  ;;  %s3856_s29 = sshll.u32 %s6064_s24, 9 }
  0x12   : > { %3820 = vmatmul.mubr.msk.f32.vlgmr.msra.gmra.mrb[0].mxu0 %vm406_vm0, %v4596_v18  ;;  %v4632_v30 = vld [vmem:[%s4587_s9 + $0x18] sm:$0xff]  ;;  %v4644_v34 = vld [vmem:[%s4587_s9 + $0x20] sm:$0xff]  ;;  %v4650_v36 = vld [vmem:[%s4587_s9 + $0x28] sm:$0xff]  ;;  %4254 = vmatprep.subr.bf16.mxu1 %v4253_v58  ;;  %s5889_s13 = scalar_lea.vmem %s6035_s7, %s3856_s29 }
  0x13   : > { %525 = vmatprep.mubr.f32.mxu0 %v4485_v7  ;;  %4260 = vmatpush3.bf16.msra.mxu0 %v4257_v15  ;;  %v4656_v37 = vld [vmem:[%s4587_s9 + $0x30] sm:$0xff]  ;;  %v4662_v38 = vld [vmem:[%s4587_s9 + $0x38] sm:$0xff]  ;;  %v4668_v39 = vld [vmem:[%s4587_s9 + $0x40] sm:$0xff] }
  0x14   : > { %4262 = vmatprep.subr.bf16.mxu0 %v4261_v19  ;;  %v4674_v40 = vld [vmem:[%s4587_s9 + $0x48] sm:$0xff]  ;;  %v4680_v41 = vld [vmem:[%s4587_s9 + $0x50] sm:$0xff]  ;;  %v363_v42 = vld [vmem:[%s4587_s9 + $0x58] sm:$0xff] }
  0x15   : > { %v364_v43 = vld [vmem:[%s4587_s9 + $0x60] sm:$0xff]  ;;  %v365_v44 = vld [vmem:[%s4587_s9 + $0x68] sm:$0xff]  ;;  %v366_v45 = vld [vmem:[%s4587_s9 + $0x70] sm:$0xff]  ;;  %4256 = vmatpush1.bf16.msra.mxu1 %v4255_v61 }
  0x16   : > { %3821 = vmatmul.mubr.msk.f32.gmra.mrb[2].mxu0 %vm406_vm0, %v4608_v22  ;;  %v367_v46 = vld [vmem:[%s4587_s9 + $0x78] sm:$0xff]  ;;  %v1015_v62 = vld [vmem:[%s6032_s4 + $0x70] sm:$0xff] }
  0x17   : > { %531 = vmatprep.mubr.f32.mxu0 %v4485_v7  ;;  %4264 = vmatpush3.bf16.msra.mxu0 %v4261_v19  ;;  %v4285_v0 = vpack.c.bf16 %v1016_v63, %v1015_v62 }
  0x18   : > { %4266 = vmatprep.subr.bf16.mxu0 %v4265_v23  ;;  %3836 = vmatmul.mubr.msk.f32.vlgmr.msra.gmra.mrb[0].mxu1 %vm406_vm0, %v4596_v18 }
  0x19   : > { %686 = vmatprep.mubr.f32.mxu1 %v4485_v7 }
  0x1a   : > { %3822 = vmatmul.mubr.msk.f32.gmra.mrb[4].mxu0 %vm406_vm0, %v4620_v26 }
  0x1b   : > { %537 = vmatprep.mubr.f32.mxu0 %v4485_v7  ;;  %4268 = vmatpush3.bf16.msra.mxu0 %v4265_v23 }
  0x1c   : > { %4270 = vmatprep.subr.bf16.mxu0 %v4269_v27  ;;  %3837 = vmatmul.mubr.msk.f32.gmra.mrb[2].mxu1 %vm406_vm0, %v4608_v22 }
  0x1d   : > { %692 = vmatprep.mubr.f32.mxu1 %v4485_v7 }
  0x1e   : > { %3823 = vmatmul.mubr.msk.f32.gmra.mrb[6].mxu0 %vm406_vm0, %v4632_v30 }
  0x1f   : > { %543 = vmatprep.mubr.f32.mxu0 %v4485_v7  ;;  %4272 = vmatpush3.bf16.msra.mxu0 %v4269_v27 }
  0x20   : > { %4274 = vmatprep.subr.bf16.mxu0 %v4273_v31  ;;  %3838 = vmatmul.mubr.msk.f32.gmra.mrb[4].mxu1 %vm406_vm0, %v4620_v26 }
  0x21   : > { %698 = vmatprep.mubr.f32.mxu1 %v4485_v7 }
  0x22   : > { %3824 = vmatmul.mubr.msk.f32.gmra.mrb[8].mxu0 %vm406_vm0, %v4644_v34 }
  0x23   : > { %549 = vmatprep.mubr.f32.mxu0 %v4485_v7  ;;  %4276 = vmatpush3.bf16.msra.mxu0 %v4273_v31 }
  0x24   : > { %4278 = vmatprep.subr.bf16.mxu0 %v4277_v35  ;;  %3839 = vmatmul.mubr.msk.f32.gmra.mrb[6].mxu1 %vm406_vm0, %v4632_v30 }
  0x25   : > { %704 = vmatprep.mubr.f32.mxu1 %v4485_v7 }
  0x26   : > { %3825 = vmatmul.mubr.msk.f32.gmra.mrb[10].mxu0 %vm406_vm0, %v4650_v36 }
  0x27   : > { %555 = vmatprep.mubr.f32.mxu0 %v4485_v7  ;;  %4280 = vmatpush3.bf16.msra.mxu0 %v4277_v35 }
  0x28   : > { %4282 = vmatprep.subr.bf16.mxu0 %v4281_v55  ;;  %3840 = vmatmul.mubr.msk.f32.gmra.mrb[8].mxu1 %vm406_vm0, %v4644_v34 }
  0x29   : > { %710 = vmatprep.mubr.f32.mxu1 %v4485_v7 }
  0x2a   : > { %3826 = vmatmul.mubr.msk.f32.gmra.mrb[12].mxu0 %vm406_vm0, %v4656_v37 }
  0x2b   : > { %561 = vmatprep.mubr.f32.mxu0 %v4485_v7  ;;  %4284 = vmatpush3.bf16.msra.mxu0 %v4281_v55 }
  0x2c   : > { %4286 = vmatprep.subr.bf16.mxu0 %v4285_v0  ;;  %3841 = vmatmul.mubr.msk.f32.gmra.mrb[10].mxu1 %vm406_vm0, %v4650_v36 }
  0x2d   : > { %716 = vmatprep.mubr.f32.mxu1 %v4485_v7 }
  0x2e   : > { %3827 = vmatmul.mubr.msk.f32.gmra.mrb[14].mxu0 %vm406_vm0, %v4662_v38 }
  0x2f   : > { %567 = vmatprep.mubr.f32.mxu0 %v4485_v7  ;;  %4288 = vmatpush3.bf16.msra.mxu0 %v4285_v0 }
  0x30   : > { %3842 = vmatmul.mubr.msk.f32.gmra.mrb[12].mxu1 %vm406_vm0, %v4656_v37 }
  0x31   : > { %722 = vmatprep.mubr.f32.mxu1 %v4485_v7 }
  0x32   : > { %3828 = vmatmul.mubr.msk.f32.gmra.mrb[16].mxu0 %vm406_vm0, %v4668_v39 }
  0x33   : > { %573 = vmatprep.mubr.f32.mxu0 %v4485_v7 }
  0x34   : > { %3843 = vmatmul.mubr.msk.f32.gmra.mrb[14].mxu1 %vm406_vm0, %v4662_v38 }
  0x35   : > { %728 = vmatprep.mubr.f32.mxu1 %v4485_v7 }
  0x36   : > { %3829 = vmatmul.mubr.msk.f32.gmra.mrb[18].mxu0 %vm406_vm0, %v4674_v40 }
  0x37   : > { %579 = vmatprep.mubr.f32.mxu0 %v4485_v7 }
  0x38   : > { %3844 = vmatmul.mubr.msk.f32.gmra.mrb[16].mxu1 %vm406_vm0, %v4668_v39 }
  0x39   : > { %734 = vmatprep.mubr.f32.mxu1 %v4485_v7 }
  0x3a   : > { %3830 = vmatmul.mubr.msk.f32.gmra.mrb[20].mxu0 %vm406_vm0, %v4680_v41 }
  0x3b   : > { %585 = vmatprep.mubr.f32.mxu0 %v4485_v7 }
  0x3c   : > { %3845 = vmatmul.mubr.msk.f32.gmra.mrb[18].mxu1 %vm406_vm0, %v4674_v40 }
  0x3d   : > { %740 = vmatprep.mubr.f32.mxu1 %v4485_v7 }
  0x3e   : > { %3831 = vmatmul.mubr.msk.f32.gmra.mrb[22].mxu0 %vm406_vm0, %v363_v42 }
  0x3f   : > { %591 = vmatprep.mubr.f32.mxu0 %v4485_v7 }
  0x40   : > { %3846 = vmatmul.mubr.msk.f32.gmra.mrb[20].mxu1 %vm406_vm0, %v4680_v41 }
  0x41   : > { %746 = vmatprep.mubr.f32.mxu1 %v4485_v7 }
  0x42   : > { %3832 = vmatmul.mubr.msk.f32.gmra.mrb[24].mxu0 %vm406_vm0, %v364_v43 }
  0x43   : > { %597 = vmatprep.mubr.f32.mxu0 %v4485_v7 }
  0x44   : > { %3847 = vmatmul.mubr.msk.f32.gmra.mrb[22].mxu1 %vm406_vm0, %v363_v42 }
  0x45   : > { %752 = vmatprep.mubr.f32.mxu1 %v4485_v7 }
  0x46   : > { %3833 = vmatmul.mubr.msk.f32.gmra.mrb[26].mxu0 %vm406_vm0, %v365_v44 }
  0x47   : > { %603 = vmatprep.mubr.f32.mxu0 %v4485_v7 }
  0x48   : > { %3848 = vmatmul.mubr.msk.f32.gmra.mrb[24].mxu1 %vm406_vm0, %v364_v43 }
  0x49   : > { %758 = vmatprep.mubr.f32.mxu1 %v4485_v7 }
  0x4a   : > { %3834 = vmatmul.mubr.msk.f32.gmra.mrb[28].mxu0 %vm406_vm0, %v366_v45 }
  0x4b   : > { %609 = vmatprep.mubr.f32.mxu0 %v4485_v7 }
  0x4c   : > { %3849 = vmatmul.mubr.msk.f32.gmra.mrb[26].mxu1 %vm406_vm0, %v365_v44 }
  0x4d   : > { %764 = vmatprep.mubr.f32.mxu1 %v4485_v7 }
  0x4e   : > { %3835 = vmatmul.mubr.msk.f32.gmra.mrb[30].mxu0 %vm406_vm0, %v367_v46 }
  0x50   : > { %3850 = vmatmul.mubr.msk.f32.gmra.mrb[28].mxu1 %vm406_vm0, %v366_v45 }
  0x51   : > { %770 = vmatprep.mubr.f32.mxu1 %v4485_v7 }
  0x54   : > { %3851 = vmatmul.mubr.msk.f32.gmra.mrb[30].mxu1 %vm406_vm0, %v367_v46 }
  0xe5   : > { %v521_v9 = vpop.f32.mrb[0].mxu0 }
  0xe6   : > { %v522_v10 = vadd.f32 %v521_v9, %v4790_v6  ;;  %v523_v11 = vpop.f32.mrb[1].mxu0 }
  0xe7   : > { %v524_v12 = vadd.f32 %v523_v11, %v4793_v8 }
  0xe8   : > { %v841_v13 = vmul.f32 0.1, %v522_v10  ;;  %vm777_vm1 = vcmp.gt.f32.partialorder %v522_v10, 0.0 }
  0xe9   : > { %v527_v14 = vpop.f32.mrb[2].mxu0  ;;  %v842_v18 = vmul.f32 0.1, %v524_v12  ;;  %vm778_vm2 = vcmp.gt.f32.partialorder %v524_v12, 0.0 }
  0xea   : > { %v528_v15 = vadd.f32 %v527_v14, %v4790_v6  ;;  %v529_v16 = vpop.f32.mrb[3].mxu0  ;;  %v905_v17 = vsel %vm777_vm1, %v522_v10, %v841_v13 }
  0xeb   : > { %v530_v19 = vadd.f32 %v529_v16, %v4793_v8  ;;  %4033 = vmatprep.mubr.f32.mxu0 %v905_v17  ;;  %v906_v27 = vsel %vm778_vm2, %v524_v12, %v842_v18 }
  0xec   : > { %vm781_vm3 = vcmp.gt.f32.partialorder %v528_v15, 0.0  ;;  %v845_v20 = vmul.f32 0.1, %v528_v15 }
  0xed   : > { %vm782_vm4 = vcmp.gt.f32.partialorder %v530_v19, 0.0  ;;  %v846_v21 = vmul.f32 0.1, %v530_v19  ;;  %v533_v22 = vpop.f32.mrb[4].mxu0 }
  0xee   : > { %v909_v23 = vsel %vm781_vm3, %v528_v15, %v845_v20  ;;  %v534_v24 = vadd.f32 %v533_v22, %v4790_v6  ;;  %v535_v25 = vpop.f32.mrb[5].mxu0 }
  0xef   : > { %v536_v26 = vadd.f32 %v535_v25, %v4793_v8  ;;  %4034 = vmatmul.mubr.f32.vlgmr.msra.gmra.mrb[32].mxu0 %v909_v23  ;;  %v910_v28 = vsel %vm782_vm4, %v530_v19, %v846_v21 }
  0xf0   : > { %v849_v29 = vmul.f32 0.1, %v534_v24  ;;  %v4289_v30 = vpack.c.bf16 %v910_v28, %v906_v27  ;;  %vm785_vm5 = vcmp.gt.f32.partialorder %v534_v24, 0.0 }
  0xf1   : > { %v539_v31 = vpop.f32.mrb[6].mxu0  ;;  %v850_v35 = vmul.f32 0.1, %v536_v26  ;;  %vm786_vm6 = vcmp.gt.f32.partialorder %v536_v26, 0.0 }
  0xf2   : > { %v540_v32 = vadd.f32 %v539_v31, %v4790_v6  ;;  %v541_v33 = vpop.f32.mrb[7].mxu0  ;;  %4290 = vmatprep.subr.bf16.mxu1 %v4289_v30  ;;  %v913_v34 = vsel %vm785_vm5, %v534_v24, %v849_v29 }
  0xf3   : > { %v542_v36 = vadd.f32 %v541_v33, %v4793_v8  ;;  %4036 = vmatprep.mubr.f32.mxu0 %v913_v34  ;;  %4292 = vmatpush3.bf16.xpose.msra.mxu1 %v4289_v30  ;;  %v914_v44 = vsel %vm786_vm6, %v536_v26, %v850_v35 }
  0xf4   : > { %v853_v37 = vmul.f32 0.1, %v540_v32  ;;  %vm789_vm7 = vcmp.gt.f32.partialorder %v540_v32, 0.0 }
  0xf5   : > { %vm790_vm8 = vcmp.gt.f32.partialorder %v542_v36, 0.0  ;;  %v854_v38 = vmul.f32 0.1, %v542_v36  ;;  %v545_v39 = vpop.f32.mrb[8].mxu0 }
  0xf6   : > { %v546_v40 = vadd.f32 %v545_v39, %v4790_v6  ;;  %v547_v41 = vpop.f32.mrb[9].mxu0  ;;  %v917_v42 = vsel %vm789_vm7, %v540_v32, %v853_v37 }
  0xf7   : > { %v548_v43 = vadd.f32 %v547_v41, %v4793_v8  ;;  %4037 = vmatmul.mubr.f32.gmra.mrb[34].mxu0 %v917_v42  ;;  %v918_v45 = vsel %vm790_vm8, %v542_v36, %v854_v38 }
  0xf8   : > { %v857_v46 = vmul.f32 0.1, %v546_v40  ;;  %v4293_v47 = vpack.c.bf16 %v918_v45, %v914_v44  ;;  %vm793_vm9 = vcmp.gt.f32.partialorder %v546_v40, 0.0 }
  0xf9   : > { %v551_v48 = vpop.f32.mrb[10].mxu0  ;;  %v858_v52 = vmul.f32 0.1, %v548_v43  ;;  %vm794_vm10 = vcmp.gt.f32.partialorder %v548_v43, 0.0 }
  0xfa   : > { %v552_v49 = vadd.f32 %v551_v48, %v4790_v6  ;;  %v553_v50 = vpop.f32.mrb[11].mxu0  ;;  %4294 = vmatprep.subr.bf16.mxu1 %v4293_v47  ;;  %v921_v51 = vsel %vm793_vm9, %v546_v40, %v857_v46 }
  0xfb   : > { %v554_v53 = vadd.f32 %v553_v50, %v4793_v8  ;;  %4039 = vmatprep.mubr.f32.mxu0 %v921_v51  ;;  %4296 = vmatpush3.bf16.xpose.msra.mxu1 %v4293_v47  ;;  %v922_v61 = vsel %vm794_vm10, %v548_v43, %v858_v52 }
  0xfc   : > { %v861_v54 = vmul.f32 0.1, %v552_v49  ;;  %vm797_vm11 = vcmp.gt.f32.partialorder %v552_v49, 0.0 }
  0xfd   : > { %vm798_vm12 = vcmp.gt.f32.partialorder %v554_v53, 0.0  ;;  %v862_v55 = vmul.f32 0.1, %v554_v53  ;;  %v557_v56 = vpop.f32.mrb[12].mxu0 }
  0xfe   : > { %v558_v57 = vadd.f32 %v557_v56, %v4790_v6  ;;  %v559_v58 = vpop.f32.mrb[13].mxu0  ;;  %v925_v59 = vsel %vm797_vm11, %v552_v49, %v861_v54 }
  0xff   : > { %v560_v60 = vadd.f32 %v559_v58, %v4793_v8  ;;  %4040 = vmatmul.mubr.f32.gmra.mrb[36].mxu0 %v925_v59  ;;  %v926_v62 = vsel %vm798_vm12, %v554_v53, %v862_v55 }
 0x100   : > { %v865_v63 = vmul.f32 0.1, %v558_v57  ;;  %v4297_v0 = vpack.c.bf16 %v926_v62, %v922_v61  ;;  %vm801_vm13 = vcmp.gt.f32.partialorder %v558_v57, 0.0 }
 0x101   : > { %v563_v5 = vpop.f32.mrb[14].mxu0  ;;  %v866_v12 = vmul.f32 0.1, %v560_v60  ;;  %vm802_vm14 = vcmp.gt.f32.partialorder %v560_v60, 0.0 }
 0x102   : > { %v564_v9 = vadd.f32 %v563_v5, %v4790_v6  ;;  %v565_v10 = vpop.f32.mrb[15].mxu0  ;;  %4298 = vmatprep.subr.bf16.mxu1 %v4297_v0  ;;  %v929_v11 = vsel %vm801_vm13, %v558_v57, %v865_v63 }
 0x103   : > { %v566_v13 = vadd.f32 %v565_v10, %v4793_v8  ;;  %4042 = vmatprep.mubr.f32.mxu0 %v929_v11  ;;  %4300 = vmatpush3.bf16.xpose.msra.mxu1 %v4297_v0  ;;  %v930_v21 = vsel %vm802_vm14, %v560_v60, %v866_v12 }
 0x104   : > { %v869_v14 = vmul.f32 0.1, %v564_v9  ;;  %vm805_vm15 = vcmp.gt.f32.partialorder %v564_v9, 0.0 }
 0x105   : > { %vm806_vm0 = vcmp.gt.f32.partialorder %v566_v13, 0.0  ;;  %v870_v15 = vmul.f32 0.1, %v566_v13  ;;  %v569_v16 = vpop.f32.mrb[16].mxu0 }
 0x106   : > { %v570_v17 = vadd.f32 %v569_v16, %v4790_v6  ;;  %v571_v18 = vpop.f32.mrb[17].mxu0  ;;  %v933_v19 = vsel %vm805_vm15, %v564_v9, %v869_v14 }
 0x107   : > { %v572_v20 = vadd.f32 %v571_v18, %v4793_v8  ;;  %4043 = vmatmul.mubr.f32.gmra.mrb[38].mxu0 %v933_v19  ;;  %v934_v22 = vsel %vm806_vm0, %v566_v13, %v870_v15 }
 0x108   : > { %v873_v23 = vmul.f32 0.1, %v570_v17  ;;  %v4301_v24 = vpack.c.bf16 %v934_v22, %v930_v21  ;;  %vm809_vm1 = vcmp.gt.f32.partialorder %v570_v17, 0.0 }
 0x109   : > { %v575_v25 = vpop.f32.mrb[18].mxu0  ;;  %v874_v29 = vmul.f32 0.1, %v572_v20  ;;  %vm810_vm2 = vcmp.gt.f32.partialorder %v572_v20, 0.0 }
 0x10a   : > { %v576_v26 = vadd.f32 %v575_v25, %v4790_v6  ;;  %v577_v27 = vpop.f32.mrb[19].mxu0  ;;  %4302 = vmatprep.subr.bf16.mxu1 %v4301_v24  ;;  %v937_v28 = vsel %vm809_vm1, %v570_v17, %v873_v23 }
 0x10b   : > { %v578_v30 = vadd.f32 %v577_v27, %v4793_v8  ;;  %4045 = vmatprep.mubr.f32.mxu0 %v937_v28  ;;  %4304 = vmatpush3.bf16.xpose.msra.mxu1 %v4301_v24  ;;  %v938_v38 = vsel %vm810_vm2, %v572_v20, %v874_v29 }
 0x10c   : > { %v877_v31 = vmul.f32 0.1, %v576_v26  ;;  %vm813_vm3 = vcmp.gt.f32.partialorder %v576_v26, 0.0 }
 0x10d   : > { %vm814_vm4 = vcmp.gt.f32.partialorder %v578_v30, 0.0  ;;  %v878_v32 = vmul.f32 0.1, %v578_v30  ;;  %v581_v33 = vpop.f32.mrb[20].mxu0 }
 0x10e   : > { %v582_v34 = vadd.f32 %v581_v33, %v4790_v6  ;;  %v583_v35 = vpop.f32.mrb[21].mxu0  ;;  %v941_v36 = vsel %vm813_vm3, %v576_v26, %v877_v31  ;;  %v1417_v31 = vld [vmem:[%s6033_s5 + $0x18] sm:$0xff] }
 0x10f   : > { %v584_v37 = vadd.f32 %v583_v35, %v4793_v8  ;;  %4046 = vmatmul.mubr.f32.gmra.mrb[40].mxu0 %v941_v36  ;;  %v942_v39 = vsel %vm814_vm4, %v578_v30, %v878_v32  ;;  %v1421_v33 = vld [vmem:[%s6033_s5 + $0x38] sm:$0xff]  ;;  %v1418_v35 = vld [vmem:[%s6033_s5 + $0x20] sm:$0xff] }
 0x110   : > { %v881_v40 = vmul.f32 0.1, %v582_v34  ;;  %v4305_v41 = vpack.c.bf16 %v942_v39, %v938_v38  ;;  %vm817_vm5 = vcmp.gt.f32.partialorder %v582_v34, 0.0  ;;  %v4353_v36 = vpack.c.bf16 %v1421_v33, %v1417_v31  ;;  %v1423_v38 = vld [vmem:[%s6033_s5 + $0x48] sm:$0xff] }
 0x111   : > { %v587_v42 = vpop.f32.mrb[22].mxu0  ;;  %v882_v46 = vmul.f32 0.1, %v584_v37  ;;  %vm818_vm6 = vcmp.gt.f32.partialorder %v584_v37, 0.0  ;;  %v1427_v39 = vld [vmem:[%s6033_s5 + $0x68] sm:$0xff] }
 0x112   : > { %v588_v43 = vadd.f32 %v587_v42, %v4790_v6  ;;  %v589_v44 = vpop.f32.mrb[23].mxu0  ;;  %4306 = vmatprep.subr.bf16.mxu1 %v4305_v41  ;;  %v945_v45 = vsel %vm817_vm5, %v582_v34, %v881_v40  ;;  %v1414_v34 = vld [vmem:[%s6033_s5] sm:$0xff]  ;;  %v4325_v40 = vpack.c.bf16 %v1427_v39, %v1423_v38 }
 0x113   : > { %v590_v47 = vadd.f32 %v589_v44, %v4793_v8  ;;  %4048 = vmatprep.mubr.f32.mxu0 %v945_v45  ;;  %4308 = vmatpush3.bf16.xpose.msra.mxu1 %v4305_v41  ;;  %v946_v55 = vsel %vm818_vm6, %v584_v37, %v882_v46  ;;  %v4323_v37 = vpack.c.bf16 %v1418_v35, %v1414_v34  ;;  %v1422_v41 = vld [vmem:[%s6033_s5 + $0x40] sm:$0xff]  ;;  %v1431_v44 = vld [vmem:[%s6033_s5 + $0x88] sm:$0xff] }
 0x114   : > { %v885_v48 = vmul.f32 0.1, %v588_v43  ;;  %vm821_vm7 = vcmp.gt.f32.partialorder %v588_v43, 0.0  ;;  %v1426_v42 = vld [vmem:[%s6033_s5 + $0x60] sm:$0xff]  ;;  %v1435_v45 = vld [vmem:[%s6033_s5 + $0xa8] sm:$0xff] }
 0x115   : > { %vm822_vm8 = vcmp.gt.f32.partialorder %v590_v47, 0.0  ;;  %v886_v49 = vmul.f32 0.1, %v590_v47  ;;  %v593_v50 = vpop.f32.mrb[24].mxu0  ;;  %v4329_v46 = vpack.c.bf16 %v1435_v45, %v1431_v44 }
 0x116   : > { %v594_v51 = vadd.f32 %v593_v50, %v4790_v6  ;;  %v595_v52 = vpop.f32.mrb[25].mxu0  ;;  %v949_v53 = vsel %vm821_vm7, %v588_v43, %v885_v48  ;;  %v4327_v43 = vpack.c.bf16 %v1426_v42, %v1422_v41  ;;  %v1434_v48 = vld [vmem:[%s6033_s5 + $0xa0] sm:$0xff]  ;;  %v1439_v50 = vld [vmem:[%s6033_s5 + $0xc8] sm:$0xff] }
 0x117   : > { %v596_v54 = vadd.f32 %v595_v52, %v4793_v8  ;;  %4049 = vmatmul.mubr.f32.gmra.mrb[42].mxu0 %v949_v53  ;;  %v950_v56 = vsel %vm822_vm8, %v590_v47, %v886_v49  ;;  %v1430_v47 = vld [vmem:[%s6033_s5 + $0x80] sm:$0xff] }
 0x118   : > { %v889_v57 = vmul.f32 0.1, %v594_v51  ;;  %v4309_v58 = vpack.c.bf16 %v950_v56, %v946_v55  ;;  %vm825_vm9 = vcmp.gt.f32.partialorder %v594_v51, 0.0  ;;  %v4331_v49 = vpack.c.bf16 %v1434_v48, %v1430_v47  ;;  %v1438_v53 = vld [vmem:[%s6033_s5 + $0xc0] sm:$0xff]  ;;  %v1447_v56 = vld [vmem:[%s6033_s5 + $0x108] sm:$0xff] }
 0x119   : > { %v599_v59 = vpop.f32.mrb[26].mxu0  ;;  %v890_v63 = vmul.f32 0.1, %v596_v54  ;;  %vm826_vm10 = vcmp.gt.f32.partialorder %v596_v54, 0.0 }
 0x11a   : > { %v600_v60 = vadd.f32 %v599_v59, %v4790_v6  ;;  %v601_v61 = vpop.f32.mrb[27].mxu0  ;;  %4310 = vmatprep.subr.bf16.mxu1 %v4309_v58  ;;  %v953_v62 = vsel %vm825_vm9, %v594_v51, %v889_v57  ;;  %v1443_v51 = vld [vmem:[%s6033_s5 + $0xe8] sm:$0xff]  ;;  %v1446_v59 = vld [vmem:[%s6033_s5 + $0x100] sm:$0xff] }
 0x11b   : > { %v602_v0 = vadd.f32 %v601_v61, %v4793_v8  ;;  %4051 = vmatprep.mubr.f32.mxu0 %v953_v62  ;;  %4312 = vmatpush3.bf16.xpose.msra.mxu1 %v4309_v58  ;;  %v954_v15 = vsel %vm826_vm10, %v596_v54, %v890_v63  ;;  %v4333_v52 = vpack.c.bf16 %v1443_v51, %v1439_v50  ;;  %v1442_v54 = vld [vmem:[%s6033_s5 + $0xe0] sm:$0xff]  ;;  %v1451_v57 = vld [vmem:[%s6033_s5 + $0x128] sm:$0xff] }
 0x11c   : > { %v893_v5 = vmul.f32 0.1, %v600_v60  ;;  %vm829_vm11 = vcmp.gt.f32.partialorder %v600_v60, 0.0  ;;  %v4335_v55 = vpack.c.bf16 %v1442_v54, %v1438_v53  ;;  %v4337_v58 = vpack.c.bf16 %v1451_v57, %v1447_v56  ;;  %v1455_v62 = vld [vmem:[%s6033_s5 + $0x148] sm:$0xff] }
 0x11d   : > { %vm830_vm12 = vcmp.gt.f32.partialorder %v602_v0, 0.0  ;;  %v894_v9 = vmul.f32 0.1, %v602_v0  ;;  %v605_v10 = vpop.f32.mrb[28].mxu0  ;;  %v1459_v63 = vld [vmem:[%s6033_s5 + $0x168] sm:$0xff] }
 0x11e   : > { %v606_v11 = vadd.f32 %v605_v10, %v4790_v6  ;;  %v607_v12 = vpop.f32.mrb[29].mxu0  ;;  %v957_v13 = vsel %vm829_vm11, %v600_v60, %v893_v5  ;;  %v1450_v60 = vld [vmem:[%s6033_s5 + $0x120] sm:$0xff] }
 0x11f   : > { %v608_v14 = vadd.f32 %v607_v12, %v4793_v8  ;;  %4052 = vmatmul.mubr.f32.gmra.mrb[44].mxu0 %v957_v13  ;;  %v958_v16 = vsel %vm830_vm12, %v602_v0, %v894_v9  ;;  %v4339_v61 = vpack.c.bf16 %v1450_v60, %v1446_v59  ;;  %v4341_v0 = vpack.c.bf16 %v1459_v63, %v1455_v62  ;;  %v1454_v5 = vld [vmem:[%s6033_s5 + $0x140] sm:$0xff]  ;;  %v1467_v12 = vld [vmem:[%s6033_s5 + $0x1a8] sm:$0xff] }
 0x120   : > { %v897_v17 = vmul.f32 0.1, %v606_v11  ;;  %v4313_v18 = vpack.c.bf16 %v958_v16, %v954_v15  ;;  %vm833_vm13 = vcmp.gt.f32.partialorder %v606_v11, 0.0  ;;  %v1458_v9 = vld [vmem:[%s6033_s5 + $0x160] sm:$0xff] }
 0x121   : > { %v611_v19 = vpop.f32.mrb[30].mxu0  ;;  %v898_v23 = vmul.f32 0.1, %v608_v14  ;;  %vm834_vm14 = vcmp.gt.f32.partialorder %v608_v14, 0.0  ;;  %v4343_v10 = vpack.c.bf16 %v1458_v9, %v1454_v5  ;;  %v1466_v15 = vld [vmem:[%s6033_s5 + $0x1a0] sm:$0xff] }
 0x122   : > { %v612_v20 = vadd.f32 %v611_v19, %v4790_v6  ;;  %v613_v21 = vpop.f32.mrb[31].mxu0  ;;  %4314 = vmatprep.subr.bf16.mxu1 %v4313_v18  ;;  %v961_v22 = vsel %vm833_vm13, %v606_v11, %v897_v17  ;;  %v1415_v6 = vld [vmem:[%s6033_s5 + $0x8] sm:$0xff]  ;;  %v396_v17 = vsub.s32 2, %v4778_v2 }
 0x123   : > { %v614_v24 = vadd.f32 %v613_v21, %v4793_v8  ;;  %4054 = vmatprep.mubr.f32.mxu0 %v961_v22  ;;  %4316 = vmatpush3.bf16.xpose.msra.mxu1 %v4313_v18  ;;  %v962_v28 = vsel %vm834_vm14, %v608_v14, %v898_v23  ;;  %v1419_v8 = vld [vmem:[%s6033_s5 + $0x28] sm:$0xff]  ;;  %v1462_v14 = vld [vmem:[%s6033_s5 + $0x180] sm:$0xff]  ;;  %v682_v18 = vpop.f32.mrb[0].mxu1  ;;  %v400_v21 = vsub.s32 3, %v4778_v2 }
 0x124   : > { %v901_v25 = vmul.f32 0.1, %v612_v20  ;;  %vm837_vm15 = vcmp.gt.f32.partialorder %v612_v20, 0.0  ;;  %v4321_v32 = vpack.c.bf16 %v1419_v8, %v1415_v6  ;;  %v1463_v11 = vld [vmem:[%s6033_s5 + $0x188] sm:$0xff]  ;;  %v4347_v16 = vpack.c.bf16 %v1466_v15, %v1462_v14  ;;  %v684_v22 = vpop.f32.mrb[1].mxu1 }
 0x125   : > { %vm838_vm0 = vcmp.gt.f32.partialorder %v614_v24, 0.0  ;;  %v902_v26 = vmul.f32 0.1, %v614_v24  ;;  %v4345_v13 = vpack.c.bf16 %v1467_v12, %v1463_v11  ;;  %v1471_v19 = vld [vmem:[%s6033_s5 + $0x1c8] sm:$0xff] }
 0x126   : > { %v965_v27 = vsel %vm837_vm15, %v612_v20, %v901_v25  ;;  %4322 = vmatprep.subr.bf16.mxu0 %v4321_v32  ;;  %v1475_v20 = vld [vmem:[%s6033_s5 + $0x1e8] sm:$0xff]  ;;  %v1474_v25 = vld [vmem:[%s6033_s5 + $0x1e0] sm:$0xff] }
 0x127   : > { %4055 = vmatmul.mubr.f32.gmra.mrb[46].mxu0 %v965_v27  ;;  %v966_v29 = vsel %vm838_vm0, %v614_v24, %v902_v26  ;;  %v4349_v23 = vpack.c.bf16 %v1475_v20, %v1471_v19  ;;  %v1470_v24 = vld [vmem:[%s6033_s5 + $0x1c0] sm:$0xff]  ;;  %v4933_v26 = vrot.slane %v4784_v4, %v396_v17  ;;  %v688_v27 = vpop.f32.mrb[2].mxu1 }
 0x128   : > { %v4317_v30 = vpack.c.bf16 %v966_v29, %v962_v28  ;;  %1542 = vmatprep.mubr.f32.mxu0 %v4485_v7  ;;  %4324 = vmatpush1.bf16.msra.mxu0 %v4323_v37  ;;  %v4351_v28 = vpack.c.bf16 %v1474_v25, %v1470_v24  ;;  %v4936_v29 = vrot.slane %v4784_v4, %v400_v21 }
 0x129   : > { %4326 = vmatprep.subr.bf16.mxu0 %v4325_v40  ;;  %v683_v6 = vadd.f32 %v682_v18, %v4933_v26  ;;  %v689_v33 = vadd.f32 %v688_v27, %v4933_v26 }
 0x12a   : > { %4318 = vmatprep.subr.bf16.mxu1 %v4317_v30  ;;  %v685_v8 = vadd.f32 %v684_v22, %v4936_v29 }
 0x12b   : > { %4320 = vmatpush3.bf16.xpose.msra.mxu1 %v4317_v30  ;;  %v690_v30 = vpop.f32.mrb[3].mxu1  ;;  %vm779_vm1 = vcmp.gt.f32.partialorder %v683_v6, 0.0  ;;  %v843_v32 = vmul.f32 0.1, %v683_v6  ;;  %v847_v41 = vmul.f32 0.1, %v689_v33 }
 0x12c   : > { %4354 = vmatprep.subr.bf16.mxu1 %v4353_v36  ;;  %4328 = vmatpush1.bf16.msra.mxu0 %v4327_v43  ;;  %v691_v31 = vadd.f32 %v690_v30, %v4936_v29  ;;  %vm780_vm2 = vcmp.gt.f32.partialorder %v685_v8, 0.0  ;;  %v844_v34 = vmul.f32 0.1, %v685_v8  ;;  %v694_v4 = vpop.f32.mrb[4].mxu1  ;;  %vm783_vm5 = vcmp.gt.f32.partialorder %v689_v33, 0.0 }
 0x12d   : > { %4330 = vmatprep.subr.bf16.mxu0 %v4329_v46  ;;  %v4942_v36 = vsel %vm779_vm1, %v683_v6, %v843_v32  ;;  %v695_v39 = vadd.f32 %v694_v4, %v4933_v26  ;;  %v696_v40 = vpop.f32.mrb[5].mxu1 }
 0x12e   : > { %vm784_vm3 = vcmp.gt.f32.partialorder %v691_v31, 0.0  ;;  %v848_v35 = vmul.f32 0.1, %v691_v31  ;;  %v908_v37 = vsel %vm780_vm2, %v685_v8, %v844_v34  ;;  %v697_v43 = vadd.f32 %v696_v40, %v4936_v29  ;;  %v700_v44 = vpop.f32.mrb[6].mxu1 }
 0x12f   : > { %v702_v45 = vpop.f32.mrb[7].mxu1  ;;  %v851_v48 = vmul.f32 0.1, %v695_v39  ;;  %vm787_vm7 = vcmp.gt.f32.partialorder %v695_v39, 0.0 }
 0x130   : > { %4332 = vmatpush1.bf16.msra.mxu0 %v4331_v49  ;;  %v912_v38 = vsel %vm784_vm3, %v691_v31, %v848_v35  ;;  %vm788_vm4 = vcmp.gt.f32.partialorder %v697_v43, 0.0  ;;  %v852_v46 = vmul.f32 0.1, %v697_v43  ;;  %v703_v47 = vadd.f32 %v702_v45, %v4936_v29  ;;  %v706_v53 = vpop.f32.mrb[8].mxu1 }
 0x131   : > { %4334 = vmatprep.subr.bf16.mxu0 %v4333_v52  ;;  %v4946_v42 = vpack.c.bf16 %v912_v38, %v908_v37  ;;  %v701_v49 = vadd.f32 %v700_v44, %v4933_v26  ;;  %v4954_v52 = vsel %vm783_vm5, %v689_v33, %v847_v41  ;;  %v707_v56 = vadd.f32 %v706_v53, %v4933_v26  ;;  %v708_v57 = vpop.f32.mrb[9].mxu1 }
 0x132   : > { %v916_v50 = vsel %vm788_vm4, %v697_v43, %v852_v46  ;;  %vm792_vm6 = vcmp.gt.f32.partialorder %v703_v47, 0.0  ;;  %v856_v51 = vmul.f32 0.1, %v703_v47  ;;  %v709_v59 = vadd.f32 %v708_v57, %v4936_v29 }
 0x133   : > { %v4962_v60 = vsel %vm787_vm7, %v695_v39, %v851_v48  ;;  %v859_v5 = vmul.f32 0.1, %v707_v56  ;;  %vm791_vm9 = vcmp.gt.f32.partialorder %v701_v49, 0.0  ;;  %vm795_vm11 = vcmp.gt.f32.partialorder %v707_v56, 0.0 }
 0x134   : > { %4336 = vmatpush1.bf16.msra.mxu0 %v4335_v55  ;;  %v920_v54 = vsel %vm792_vm6, %v703_v47, %v856_v51  ;;  %vm796_vm8 = vcmp.gt.f32.partialorder %v709_v59, 0.0  ;;  %v860_v63 = vmul.f32 0.1, %v709_v59 }
 0x135   : > { %4338 = vmatprep.subr.bf16.mxu0 %v4337_v58  ;;  %v4958_v55 = vpack.c.bf16 %v920_v54, %v916_v50  ;;  %v855_v58 = vmul.f32 0.1, %v701_v49  ;;  %v4978_v20 = vsel %vm795_vm11, %v707_v56, %v859_v5 }
 0x137   : > { %v4970_v12 = vsel %vm791_vm9, %v701_v49, %v855_v58 }
 0x138   : > { %4340 = vmatpush1.bf16.msra.mxu0 %v4339_v61  ;;  %v712_v61 = vpop.f32.mrb[10].mxu1 }
 0x139   : > { %4342 = vmatprep.subr.bf16.mxu0 %v4341_v0  ;;  %v714_v62 = vpop.f32.mrb[11].mxu1  ;;  %v713_v9 = vadd.f32 %v712_v61, %v4933_v26 }
 0x13a   : > { %v715_v0 = vadd.f32 %v714_v62, %v4936_v29 }
 0x13b   : > { %v863_v18 = vmul.f32 0.1, %v713_v9  ;;  %vm799_vm13 = vcmp.gt.f32.partialorder %v713_v9, 0.0 }
 0x13c   : > { %4344 = vmatpush1.bf16.msra.mxu0 %v4343_v10  ;;  %v924_v10 = vsel %vm796_vm8, %v709_v59, %v860_v63  ;;  %vm800_vm10 = vcmp.gt.f32.partialorder %v715_v0, 0.0  ;;  %v864_v11 = vmul.f32 0.1, %v715_v0 }
 0x13d   : > { %4346 = vmatprep.subr.bf16.mxu0 %v4345_v13  ;;  %v718_v13 = vpop.f32.mrb[12].mxu1  ;;  %v4986_v6 = vsel %vm799_vm13, %v713_v9, %v863_v18 }
 0x13e   : > { %v928_v14 = vsel %vm800_vm10, %v715_v0, %v864_v11  ;;  %v720_v17 = vpop.f32.mrb[13].mxu1 }
 0x13f   : > { %v4974_v15 = vpack.c.bf16 %v928_v14, %v924_v10  ;;  %v721_v19 = vadd.f32 %v720_v17, %v4936_v29  ;;  %v724_v21 = vpop.f32.mrb[14].mxu1 }
 0x140   : > { %4348 = vmatpush1.bf16.msra.mxu0 %v4347_v16  ;;  %v719_v16 = vadd.f32 %v718_v13, %v4933_v26  ;;  %v726_v22 = vpop.f32.mrb[15].mxu1  ;;  %v725_v27 = vadd.f32 %v724_v21, %v4933_v26 }
 0x141   : > { %4350 = vmatprep.subr.bf16.mxu0 %v4349_v23  ;;  %vm804_vm12 = vcmp.gt.f32.partialorder %v721_v19, 0.0  ;;  %v868_v23 = vmul.f32 0.1, %v721_v19  ;;  %v727_v24 = vadd.f32 %v726_v22, %v4936_v29  ;;  %v730_v8 = vpop.f32.mrb[16].mxu1 }
 0x142   : > { %v867_v25 = vmul.f32 0.1, %v719_v16  ;;  %v731_v33 = vadd.f32 %v730_v8, %v4933_v26  ;;  %v732_v34 = vpop.f32.mrb[17].mxu1  ;;  %vm803_vm15 = vcmp.gt.f32.partialorder %v719_v16, 0.0  ;;  %v871_v35 = vmul.f32 0.1, %v725_v27 }
 0x143   : > { %vm808_vm14 = vcmp.gt.f32.partialorder %v727_v24, 0.0  ;;  %v872_v30 = vmul.f32 0.1, %v727_v24  ;;  %v733_v4 = vadd.f32 %v732_v34, %v4936_v29  ;;  %v736_v38 = vpop.f32.mrb[18].mxu1  ;;  %vm807_vm1 = vcmp.gt.f32.partialorder %v725_v27, 0.0 }
 0x144   : > { %4352 = vmatpush1.bf16.msra.mxu0 %v4351_v28  ;;  %v932_v28 = vsel %vm804_vm12, %v721_v19, %v868_v23  ;;  %v4994_v37 = vsel %vm803_vm15, %v719_v16, %v867_v25  ;;  %v738_v39 = vpop.f32.mrb[19].mxu1  ;;  %v875_v43 = vmul.f32 0.1, %v731_v33  ;;  %v5001_v46 = vsel %vm807_vm1, %v725_v27, %v871_v35 }
 0x145   : > { %4386 = vmatprep.subr.bf16.mxu0 %v4946_v42  ;;  %v936_v31 = vsel %vm808_vm14, %v727_v24, %v872_v30  ;;  %vm812_vm0 = vcmp.gt.f32.partialorder %v733_v4, 0.0  ;;  %v876_v40 = vmul.f32 0.1, %v733_v4  ;;  %v739_v41 = vadd.f32 %v738_v39, %v4936_v29  ;;  %v742_v53 = vpop.f32.mrb[20].mxu1 }
 0x146   : > { %v4990_v32 = vpack.c.bf16 %v936_v31, %v932_v28  ;;  %v737_v47 = vadd.f32 %v736_v38, %v4933_v26  ;;  %vm811_vm3 = vcmp.gt.f32.partialorder %v731_v33, 0.0  ;;  %v743_v54 = vadd.f32 %v742_v53, %v4933_v26  ;;  %v744_v56 = vpop.f32.mrb[21].mxu1 }
 0x147   : > { %1543 = vmatmul.mubr.f32.vlgmr.msra.gmra.mrb[48].mxu0 %v4942_v36  ;;  %v940_v44 = vsel %vm812_vm0, %v733_v4, %v876_v40  ;;  %vm816_vm2 = vcmp.gt.f32.partialorder %v739_v41, 0.0  ;;  %v880_v45 = vmul.f32 0.1, %v739_v41  ;;  %v5008_v50 = vsel %vm811_vm3, %v731_v33, %v875_v43  ;;  %v748_v61 = vpop.f32.mrb[22].mxu1 }
 0x148   : > { %1548 = vmatprep.mubr.f32.mxu0 %v4485_v7  ;;  %v879_v51 = vmul.f32 0.1, %v737_v47  ;;  %vm815_vm4 = vcmp.gt.f32.partialorder %v737_v47, 0.0  ;;  %v745_v58 = vadd.f32 %v744_v56, %v4936_v29  ;;  %v883_v59 = vmul.f32 0.1, %v743_v54  ;;  %v750_v0 = vpop.f32.mrb[23].mxu1 }
 0x149   : > { %v944_v48 = vsel %vm816_vm2, %v739_v41, %v880_v45  ;;  %v749_v63 = vadd.f32 %v748_v61, %v4933_v26  ;;  %vm819_vm6 = vcmp.gt.f32.partialorder %v743_v54, 0.0  ;;  %v751_v5 = vadd.f32 %v750_v0, %v4936_v29  ;;  %v754_v14 = vpop.f32.mrb[24].mxu1  ;;  %v1425_v0 = vld [vmem:[%s6033_s5 + $0x58] sm:$0xff] }
 0x14a   : > { %v5006_v49 = vpack.c.bf16 %v944_v48, %v940_v44  ;;  %v5015_v57 = vsel %vm815_vm4, %v737_v47, %v879_v51  ;;  %vm820_vm5 = vcmp.gt.f32.partialorder %v745_v58, 0.0  ;;  %v884_v62 = vmul.f32 0.1, %v745_v58  ;;  %v756_v18 = vpop.f32.mrb[25].mxu1 }
 0x14b   : > { %1549 = vmatmul.mubr.f32.gmra.mrb[50].mxu0 %v4954_v52  ;;  %v5022_v9 = vsel %vm819_vm6, %v743_v54, %v883_v59  ;;  %v887_v10 = vmul.f32 0.1, %v749_v63  ;;  %vm824_vm7 = vcmp.gt.f32.partialorder %v751_v5, 0.0  ;;  %v888_v13 = vmul.f32 0.1, %v751_v5  ;;  %v760_v24 = vpop.f32.mrb[26].mxu1 }
 0x14c   : > { %1554 = vmatprep.mubr.f32.mxu0 %v4485_v7  ;;  %v948_v11 = vsel %vm820_vm5, %v745_v58, %v884_v62  ;;  %vm823_vm8 = vcmp.gt.f32.partialorder %v749_v63, 0.0  ;;  %v755_v17 = vadd.f32 %v754_v14, %v4933_v26  ;;  %v757_v22 = vadd.f32 %v756_v18, %v4936_v29  ;;  %v762_v28 = vpop.f32.mrb[27].mxu1  ;;  %v1433_v18 = vld [vmem:[%s6033_s5 + $0x98] sm:$0xff] }
 0x14d   : > { %4388 = vmatpush3.bf16.xpose.msra.mxu0 %v4946_v42  ;;  %v952_v16 = vsel %vm824_vm7, %v751_v5, %v888_v13  ;;  %v5027_v19 = vsel %vm823_vm8, %v749_v63, %v887_v10  ;;  %v761_v27 = vadd.f32 %v760_v24, %v4933_v26  ;;  %v763_v30 = vadd.f32 %v762_v28, %v4936_v29  ;;  %v766_v35 = vpop.f32.mrb[28].mxu1  ;;  %v1420_v63 = vld [vmem:[%s6033_s5 + $0x30] sm:$0xff]  ;;  %v1429_v5 = vld [vmem:[%s6033_s5 + $0x78] sm:$0xff] }
 0x14e   : > { %4390 = vmatprep.subr.bf16.mxu0 %v4958_v55  ;;  %v5029_v21 = vpack.c.bf16 %v952_v16, %v948_v11  ;;  %v891_v23 = vmul.f32 0.1, %v755_v17  ;;  %vm828_vm9 = vcmp.gt.f32.partialorder %v757_v22, 0.0  ;;  %v892_v25 = vmul.f32 0.1, %v757_v22  ;;  %v768_v39 = vpop.f32.mrb[29].mxu1 }
 0x14f   : > { %1555 = vmatmul.mubr.f32.gmra.mrb[52].mxu0 %v4962_v60  ;;  %vm827_vm10 = vcmp.gt.f32.partialorder %v755_v17, 0.0  ;;  %v895_v31 = vmul.f32 0.1, %v761_v27  ;;  %vm832_vm11 = vcmp.gt.f32.partialorder %v763_v30, 0.0  ;;  %v896_v34 = vmul.f32 0.1, %v763_v30 }
 0x150   : > { %1560 = vmatprep.mubr.f32.mxu0 %v4485_v7  ;;  %v5038_v8 = vsel %vm827_vm10, %v755_v17, %v891_v23  ;;  %v956_v33 = vsel %vm828_vm9, %v757_v22, %v892_v25  ;;  %vm831_vm12 = vcmp.gt.f32.partialorder %v761_v27, 0.0  ;;  %v767_v38 = vadd.f32 %v766_v35, %v4933_v26  ;;  %v772_v45 = vpop.f32.mrb[30].mxu1  ;;  %v1424_v16 = vld [vmem:[%s6033_s5 + $0x50] sm:$0xff]  ;;  %v1437_v22 = vld [vmem:[%s6033_s5 + $0xb8] sm:$0xff] }
 0x151   : > { %v960_v4 = vsel %vm832_vm11, %v763_v30, %v896_v34  ;;  %v5043_v40 = vsel %vm831_vm12, %v761_v27, %v895_v31  ;;  %v769_v43 = vadd.f32 %v768_v39, %v4936_v29  ;;  %v773_v48 = vadd.f32 %v772_v45, %v4933_v26  ;;  %v774_v51 = vpop.f32.mrb[31].mxu1  ;;  %v1428_v17 = vld [vmem:[%s6033_s5 + $0x70] sm:$0xff]  ;;  %v1441_v28 = vld [vmem:[%s6033_s5 + $0xd8] sm:$0xff] }
 0x152   : > { %v5045_v41 = vpack.c.bf16 %v960_v4, %v956_v33  ;;  %v899_v44 = vmul.f32 0.1, %v767_v38  ;;  %vm835_vm14 = vcmp.gt.f32.partialorder %v767_v38, 0.0  ;;  %v775_v53 = vadd.f32 %v774_v51, %v4936_v29  ;;  %v1416_v29 = vld [vmem:[%s6033_s5 + $0x10] sm:$0xff]  ;;  %v1445_v30 = vld [vmem:[%s6033_s5 + $0xf8] sm:$0xff] }
 0x153   : > { %1561 = vmatmul.mubr.f32.gmra.mrb[54].mxu0 %v4970_v12  ;;  %vm836_vm13 = vcmp.gt.f32.partialorder %v769_v43, 0.0  ;;  %v900_v47 = vmul.f32 0.1, %v769_v43  ;;  %v903_v56 = vmul.f32 0.1, %v773_v48  ;;  %vm839_vm0 = vcmp.gt.f32.partialorder %v773_v48, 0.0 }
 0x154   : > { %1566 = vmatprep.mubr.f32.mxu0 %v4485_v7  ;;  %v5054_v54 = vsel %vm835_vm14, %v767_v38, %v899_v44  ;;  %vm840_vm15 = vcmp.gt.f32.partialorder %v775_v53, 0.0  ;;  %v904_v59 = vmul.f32 0.1, %v775_v53  ;;  %v4355_v11 = vpack.c.bf16 %v1420_v63, %v1416_v29  ;;  %v1432_v25 = vld [vmem:[%s6033_s5 + $0x90] sm:$0xff]  ;;  %v1449_v39 = vld [vmem:[%s6033_s5 + $0x118] sm:$0xff] }
 0x155   : > { %4392 = vmatpush3.bf16.xpose.msra.mxu0 %v4958_v55  ;;  %v964_v58 = vsel %vm836_vm13, %v769_v43, %v900_v47  ;;  %v5058_v62 = vsel %vm839_vm0, %v773_v48, %v903_v56  ;;  %v4357_v14 = vpack.c.bf16 %v1429_v5, %v1425_v0  ;;  %v4359_v23 = vpack.c.bf16 %v1428_v17, %v1424_v16  ;;  %v1436_v27 = vld [vmem:[%s6033_s5 + $0xb0] sm:$0xff]  ;;  %v1453_v43 = vld [vmem:[%s6033_s5 + $0x138] sm:$0xff] }
 0x156   : > { %4394 = vmatprep.subr.bf16.mxu0 %v4974_v15  ;;  %v968_v61 = vsel %vm840_vm15, %v775_v53, %v904_v59  ;;  %v4361_v24 = vpack.c.bf16 %v1437_v22, %v1433_v18  ;;  %v4363_v33 = vpack.c.bf16 %v1436_v27, %v1432_v25  ;;  %v4365_v35 = vpack.c.bf16 %v1445_v30, %v1441_v28  ;;  %v1440_v4 = vld [vmem:[%s6033_s5 + $0xd0] sm:$0xff]  ;;  %v1457_v51 = vld [vmem:[%s6033_s5 + $0x158] sm:$0xff] }
 0x157   : > { %1567 = vmatmul.mubr.f32.gmra.mrb[56].mxu0 %v4978_v20  ;;  %v5060_v26 = vpack.c.bf16 %v968_v61, %v964_v58  ;;  %v1444_v38 = vld [vmem:[%s6033_s5 + $0xf0] sm:$0xff]  ;;  %v4369_v45 = vpack.c.bf16 %v1453_v43, %v1449_v39  ;;  %v1461_v53 = vld [vmem:[%s6033_s5 + $0x178] sm:$0xff] }
 0x158   : > { %1572 = vmatprep.mubr.f32.mxu0 %v4485_v7  ;;  %v4367_v44 = vpack.c.bf16 %v1444_v38, %v1440_v4  ;;  %v1448_v47 = vld [vmem:[%s6033_s5 + $0x110] sm:$0xff]  ;;  %v4373_v61 = vpack.c.bf16 %v1461_v53, %v1457_v51  ;;  %v1465_v0 = vld [vmem:[%s6033_s5 + $0x198] sm:$0xff] }
 0x159   : > { %v1452_v48 = vld [vmem:[%s6033_s5 + $0x130] sm:$0xff]  ;;  %v1469_v5 = vld [vmem:[%s6033_s5 + $0x1b8] sm:$0xff] }
 0x15a   : > { %v4371_v58 = vpack.c.bf16 %v1452_v48, %v1448_v47  ;;  %v1456_v29 = vld [vmem:[%s6033_s5 + $0x150] sm:$0xff]  ;;  %v1473_v16 = vld [vmem:[%s6033_s5 + $0x1d8] sm:$0xff] }
 0x15b   : > { %1573 = vmatmul.mubr.f32.gmra.mrb[58].mxu0 %v4986_v6  ;;  %v1460_v63 = vld [vmem:[%s6033_s5 + $0x170] sm:$0xff]  ;;  %v1477_v17 = vld [vmem:[%s6033_s5 + $0x1f8] sm:$0xff] }
 0x15c   : > { %1578 = vmatprep.mubr.f32.mxu0 %v4485_v7  ;;  %v1472_v25 = vld [vmem:[%s6033_s5 + $0x1d0] sm:$0xff] }
 0x15d   : > { %4396 = vmatpush3.bf16.xpose.msra.mxu0 %v4974_v15  ;;  %v1476_v27 = vld [vmem:[%s6033_s5 + $0x1f0] sm:$0xff] }
 0x15e   : > { %4398 = vmatprep.subr.bf16.mxu0 %v4990_v32  ;;  %v4383_v28 = vpack.c.bf16 %v1476_v27, %v1472_v25  ;;  %v1309_v27 = vadd.s32 8, %v4778_v2 }
 0x15f   : > { %1579 = vmatmul.mubr.f32.gmra.mrb[60].mxu0 %v4994_v37 }
 0x160   : > { %1584 = vmatprep.mubr.f32.mxu0 %v4485_v7 }
 0x163   : > { %1585 = vmatmul.mubr.f32.gmra.mrb[62].mxu0 %v5001_v46 }
 0x164   : > { %1590 = vmatprep.mubr.f32.mxu0 %v4485_v7 }
 0x165   : > { %4400 = vmatpush3.bf16.xpose.msra.mxu0 %v4990_v32 }
 0x166   : > { %4402 = vmatprep.subr.bf16.mxu0 %v5006_v49 }
 0x167   : > { %1591 = vmatmul.mubr.f32.gmra.mrb[64].mxu0 %v5008_v50 }
 0x168   : > { %1596 = vmatprep.mubr.f32.mxu0 %v4485_v7 }
 0x16b   : > { %1597 = vmatmul.mubr.f32.gmra.mrb[66].mxu0 %v5015_v57 }
 0x16c   : > { %1602 = vmatprep.mubr.f32.mxu0 %v4485_v7 }
 0x16d   : > { %4404 = vmatpush3.bf16.xpose.msra.mxu0 %v5006_v49 }
 0x16e   : > { %4406 = vmatprep.subr.bf16.mxu0 %v5029_v21 }
 0x16f   : > { %1603 = vmatmul.mubr.f32.gmra.mrb[68].mxu0 %v5022_v9 }
 0x170   : > { %1608 = vmatprep.mubr.f32.mxu0 %v4485_v7 }
 0x173   : > { %1609 = vmatmul.mubr.f32.gmra.mrb[70].mxu0 %v5027_v19 }
 0x174   : > { %1614 = vmatprep.mubr.f32.mxu0 %v4485_v7 }
 0x175   : > { %4408 = vmatpush3.bf16.xpose.msra.mxu0 %v5029_v21 }
 0x176   : > { %4410 = vmatprep.subr.bf16.mxu0 %v5045_v41 }
 0x177   : > { %1615 = vmatmul.mubr.f32.gmra.mrb[72].mxu0 %v5038_v8 }
 0x178   : > { %1620 = vmatprep.mubr.f32.mxu0 %v4485_v7 }
 0x17b   : > { %1621 = vmatmul.mubr.f32.gmra.mrb[74].mxu0 %v5043_v40 }
 0x17c   : > { %1626 = vmatprep.mubr.f32.mxu0 %v4485_v7 }
 0x17d   : > { %4412 = vmatpush3.bf16.xpose.msra.mxu0 %v5045_v41 }
 0x17e   : > { %4414 = vmatprep.subr.bf16.mxu0 %v5060_v26 }
 0x17f   : > { %1627 = vmatmul.mubr.f32.gmra.mrb[76].mxu0 %v5054_v54 }
 0x180   : > { %1632 = vmatprep.mubr.f32.mxu0 %v4485_v7 }
 0x183   : > { %1633 = vmatmul.mubr.f32.gmra.mrb[78].mxu0 %v5058_v62 }
 0x185   : > { %4416 = vmatpush3.bf16.xpose.msra.mxu0 %v5060_v26 }
 0x1c2   : > { %v4035_v10 = vpop.f32.mrb[32].mxu0 }
 0x1c3   : > { %v1083_v13 = vpop.f32.mrb[33].mxu0 }
 0x1c4   : > { %4089 = vmatprep.mubr.f32.mxu1 %v1083_v13  ;;  %v1464_v13 = vld [vmem:[%s6033_s5 + $0x190] sm:$0xff] }
 0x1c5   : > { %4090 = vmatmul.mubr.f32.vlgmr.msra.gmra.mrb[32].mxu1 %v4035_v10  ;;  %v4375_v10 = vpack.c.bf16 %v1460_v63, %v1456_v29 }
 0x1c6   : > { %4356 = vmatpush1.bf16.msra.mxu1 %v4355_v11  ;;  %v4377_v11 = vpack.c.bf16 %v1469_v5, %v1465_v0 }
 0x1c7   : > { %4358 = vmatprep.subr.bf16.mxu1 %v4357_v14  ;;  %v1468_v14 = vld [vmem:[%s6033_s5 + $0x1b0] sm:$0xff] }
 0x1c8   : > { %v4379_v22 = vpack.c.bf16 %v1468_v14, %v1464_v13 }
 0x1ca   : > { %v4038_v31 = vpop.f32.mrb[34].mxu0  ;;  %4360 = vmatpush1.bf16.msra.mxu1 %v4359_v23 }
 0x1cb   : > { %v1093_v34 = vpop.f32.mrb[35].mxu0  ;;  %4362 = vmatprep.subr.bf16.mxu1 %v4361_v24  ;;  %v4381_v24 = vpack.c.bf16 %v1477_v17, %v1473_v16  ;;  %v1326_v16 = vld [vmem:[%s328_s28] sm:$0x1] }
 0x1cc   : > { %4092 = vmatprep.mubr.f32.mxu1 %v1093_v34  ;;  %vm1327_vm1 = vcmp.gt.f32.partialorder %v1326_v16, 0.0 }
 0x1cd   : > { %4093 = vmatmul.mubr.f32.gmra.mrb[34].mxu1 %v4038_v31 }
 0x1ce   : > { %4364 = vmatpush1.bf16.msra.mxu1 %v4363_v33 }
 0x1cf   : > { %4366 = vmatprep.subr.bf16.mxu1 %v4365_v35 }
 0x1d2   : > { %v4041_v56 = vpop.f32.mrb[36].mxu0  ;;  %4368 = vmatpush1.bf16.msra.mxu1 %v4367_v44 }
 0x1d3   : > { %v1103_v59 = vpop.f32.mrb[37].mxu0  ;;  %4370 = vmatprep.subr.bf16.mxu1 %v4369_v45 }
 0x1d4   : > { %4095 = vmatprep.mubr.f32.mxu1 %v1103_v59 }
 0x1d5   : > { %4096 = vmatmul.mubr.f32.gmra.mrb[36].mxu1 %v4041_v56 }
 0x1d6   : > { %4372 = vmatpush1.bf16.msra.mxu1 %v4371_v58 }
 0x1d7   : > { %4374 = vmatprep.subr.bf16.mxu1 %v4373_v61 }
 0x1da   : > { %v4044_v18 = vpop.f32.mrb[38].mxu0  ;;  %4376 = vmatpush1.bf16.msra.mxu1 %v4375_v10 }
 0x1db   : > { %v1113_v23 = vpop.f32.mrb[39].mxu0  ;;  %4378 = vmatprep.subr.bf16.mxu1 %v4377_v11 }
 0x1dc   : > { %4098 = vmatprep.mubr.f32.mxu1 %v1113_v23 }
 0x1dd   : > { %4099 = vmatmul.mubr.f32.gmra.mrb[38].mxu1 %v4044_v18 }
 0x1de   : > { %4380 = vmatpush1.bf16.msra.mxu1 %v4379_v22 }
 0x1df   : > { %4382 = vmatprep.subr.bf16.mxu1 %v4381_v24  ;;  %v4486_v24 = vmov 0  }
 0x1e0   : > { %v1344_v25 = vsel %vm1327_vm1, 1, %v4486_v24 }
 0x1e2   : > { %v4047_v30 = vpop.f32.mrb[40].mxu0  ;;  %4384 = vmatpush1.bf16.msra.mxu1 %v4383_v28  ;;  %v5305_v28 = vand.u32 127, %v386_v1  ;;  %v1311_v1 = vadd.s32 24, %v4778_v2 }
 0x1e3   : > { %v1123_v31 = vpop.f32.mrb[41].mxu0  ;;  %4417 = vmatprep.subr.bf16.mxu1 %v4946_v42 }
 0x1e4   : > { %4101 = vmatprep.mubr.f32.mxu1 %v1123_v31  ;;  %vm1329_vm2 = vcmp.ne.s32.totalorder %v1309_v27, %v5305_v28  ;;  %vm1328_vm4 = vcmp.ne.s32.totalorder %v4778_v2, %v5305_v28  ;;  %vm1331_vm7 = vcmp.ne.s32.totalorder %v1311_v1, %v5305_v28 }
 0x1e5   : > { %4102 = vmatmul.mubr.f32.gmra.mrb[40].mxu1 %v4047_v30  ;;  %v5309_v30 = vrot.slane %v1344_v25, %v388_v3 }
 0x1e7   : > { %vm1349_vm3 = vcmp.eq.s32.totalorder %v5309_v30, 1 }
 0x1e8   : > { %vm1351_vm5 = vmand %vm1349_vm3, %vm1329_vm2 }
 0x1e9   : > { %vm1350_vm6 = vmand %vm1349_vm3, %vm1328_vm4 }
 0x1ea   : > { %v4050_v33 = vpop.f32.mrb[42].mxu0  ;;  %vm1353_vm9 = vmand %vm1349_vm3, %vm1331_vm7 }
 0x1eb   : > { %v1133_v34 = vpop.f32.mrb[43].mxu0 }
 0x1ec   : > { %4104 = vmatprep.mubr.f32.mxu1 %v1133_v34 }
 0x1ed   : > { %4105 = vmatmul.mubr.f32.gmra.mrb[42].mxu1 %v4050_v33 }
 0x1f2   : > { %v4053_v35 = vpop.f32.mrb[44].mxu0 }
 0x1f3   : > { %v1143_v4 = vpop.f32.mrb[45].mxu0 }
 0x1f4   : > { %4107 = vmatprep.mubr.f32.mxu1 %v1143_v4  ;;  %v1310_v4 = vadd.s32 16, %v4778_v2 }
 0x1f5   : > { %4108 = vmatmul.mubr.f32.gmra.mrb[44].mxu1 %v4053_v35 }
 0x1f6   : > { %vm1330_vm8 = vcmp.ne.s32.totalorder %v1310_v4, %v5305_v28 }
 0x1f7   : > { %vm1352_vm10 = vmand %vm1349_vm3, %vm1330_vm8 }
 0x1fa   : > { %v4056_v38 = vpop.f32.mrb[46].mxu0 }
 0x1fb   : > { %v1153_v39 = vpop.f32.mrb[47].mxu0 }
 0x1fc   : > { %4110 = vmatprep.mubr.f32.mxu1 %v1153_v39 }
 0x1fd   : > { %4111 = vmatmul.mubr.f32.gmra.mrb[46].mxu1 %v4056_v38 }
 0x1fe   : > { %1703 = vmatprep.mubr.f32.mxu1 %v4485_v7 }
 0x201   : > { %1704 = vmatmul.mubr.f32.vlgmr.msra.gmra.mrb[48].mxu1 %v4942_v36 }
 0x202   : > { %4425 = vmatpush3.bf16.xpose.msra.mxu1 %v4946_v42  ;;  %1709 = vmatprep.mubr.f32.mxu1 %v4485_v7 }
 0x203   : > { %4418 = vmatprep.subr.bf16.mxu1 %v4958_v55 }
 0x205   : > { %1710 = vmatmul.mubr.f32.gmra.mrb[50].mxu1 %v4954_v52 }
 0x206   : > { %1715 = vmatprep.mubr.f32.mxu1 %v4485_v7 }
 0x209   : > { %1716 = vmatmul.mubr.f32.gmra.mrb[52].mxu1 %v4962_v60 }
 0x20a   : > { %4426 = vmatpush3.bf16.xpose.msra.mxu1 %v4958_v55  ;;  %1721 = vmatprep.mubr.f32.mxu1 %v4485_v7 }
 0x20b   : > { %4419 = vmatprep.subr.bf16.mxu1 %v4974_v15 }
 0x20d   : > { %1722 = vmatmul.mubr.f32.gmra.mrb[54].mxu1 %v4970_v12 }
 0x20e   : > { %1727 = vmatprep.mubr.f32.mxu1 %v4485_v7 }
 0x211   : > { %1728 = vmatmul.mubr.f32.gmra.mrb[56].mxu1 %v4978_v20 }
 0x212   : > { %4427 = vmatpush3.bf16.xpose.msra.mxu1 %v4974_v15  ;;  %1733 = vmatprep.mubr.f32.mxu1 %v4485_v7 }
 0x213   : > { %4420 = vmatprep.subr.bf16.mxu1 %v4990_v32 }
 0x215   : > { %1734 = vmatmul.mubr.f32.gmra.mrb[58].mxu1 %v4986_v6 }
 0x216   : > { %1739 = vmatprep.mubr.f32.mxu1 %v4485_v7 }
 0x219   : > { %1740 = vmatmul.mubr.f32.gmra.mrb[60].mxu1 %v4994_v37 }
 0x21a   : > { %4428 = vmatpush3.bf16.xpose.msra.mxu1 %v4990_v32  ;;  %1745 = vmatprep.mubr.f32.mxu1 %v4485_v7  ;;  %v5203_v36 = vpop.f32.mrb[48].mxu0 }
 0x21b   : > { %4421 = vmatprep.subr.bf16.mxu1 %v5006_v49  ;;  %v5205_v42 = vpop.f32.mrb[49].mxu0 }
 0x21c   : > { %v1864_v52 = vcombine.low %v5203_v36, %v5205_v42  ;;  %v1865_v55 = vcombine.high %v5203_v36, %v5205_v42 }
 0x21d   : > { %1746 = vmatmul.mubr.f32.gmra.mrb[62].mxu1 %v5001_v46 }
 0x21e   : > { %1751 = vmatprep.mubr.f32.mxu1 %v4485_v7  ;;  %v5211_v60 = vpop.f32.mrb[50].mxu0 }
 0x21f   : > { %v5213_v12 = vpop.f32.mrb[51].mxu0 }
 0x220   : > { %v1900_v15 = vcombine.low %v5211_v60, %v5213_v12 }
 0x221   : > { %1752 = vmatmul.mubr.f32.gmra.mrb[64].mxu1 %v5008_v50 }
 0x222   : > { %4429 = vmatpush3.bf16.xpose.msra.mxu1 %v5006_v49  ;;  %1757 = vmatprep.mubr.f32.mxu1 %v4485_v7  ;;  %v5219_v20 = vpop.f32.mrb[52].mxu0 }
 0x223   : > { %4422 = vmatprep.subr.bf16.mxu1 %v5029_v21  ;;  %v5221_v6 = vpop.f32.mrb[53].mxu0 }
 0x224   : > { %v1936_v32 = vcombine.low %v5219_v20, %v5221_v6  ;;  %v1937_v37 = vcombine.high %v5219_v20, %v5221_v6 }
 0x225   : > { %1758 = vmatmul.mubr.f32.gmra.mrb[66].mxu1 %v5015_v57 }
 0x226   : > { %1763 = vmatprep.mubr.f32.mxu1 %v4485_v7  ;;  %v5227_v46 = vpop.f32.mrb[54].mxu0 }
 0x227   : > { %v5229_v49 = vpop.f32.mrb[55].mxu0 }
 0x228   : > { %v1972_v50 = vcombine.low %v5227_v46, %v5229_v49  ;;  %v1973_v57 = vcombine.high %v5227_v46, %v5229_v49 }
 0x229   : > { %1764 = vmatmul.mubr.f32.gmra.mrb[68].mxu1 %v5022_v9 }
 0x22a   : > { %4430 = vmatpush3.bf16.xpose.msra.mxu1 %v5029_v21  ;;  %1769 = vmatprep.mubr.f32.mxu1 %v4485_v7  ;;  %v5235_v9 = vpop.f32.mrb[56].mxu0 }
 0x22b   : > { %4423 = vmatprep.subr.bf16.mxu1 %v5045_v41 }
 0x22d   : > { %1770 = vmatmul.mubr.f32.gmra.mrb[70].mxu1 %v5027_v19  ;;  %v5237_v19 = vpop.f32.mrb[57].mxu0 }
 0x22e   : > { %1775 = vmatprep.mubr.f32.mxu1 %v4485_v7  ;;  %v2008_v21 = vcombine.low %v5235_v9, %v5237_v19 }
 0x231   : > { %1776 = vmatmul.mubr.f32.gmra.mrb[72].mxu1 %v5038_v8  ;;  %v2009_v8 = vcombine.high %v5235_v9, %v5237_v19 }
 0x232   : > { %4431 = vmatpush3.bf16.xpose.msra.mxu1 %v5045_v41  ;;  %1781 = vmatprep.mubr.f32.mxu1 %v4485_v7 }
 0x233   : > { %4424 = vmatprep.subr.bf16.mxu1 %v5060_v26 }
 0x235   : > { %1782 = vmatmul.mubr.f32.gmra.mrb[74].mxu1 %v5043_v40  ;;  %v5243_v40 = vpop.f32.mrb[58].mxu0 }
 0x236   : > { %1787 = vmatprep.mubr.f32.mxu1 %v4485_v7  ;;  %v5245_v41 = vpop.f32.mrb[59].mxu0 }
 0x239   : > { %1788 = vmatmul.mubr.f32.gmra.mrb[76].mxu1 %v5054_v54  ;;  %v2044_v54 = vcombine.low %v5243_v40, %v5245_v41 }
 0x23a   : > { %4432 = vmatpush3.bf16.xpose.msra.mxu1 %v5060_v26  ;;  %1793 = vmatprep.mubr.f32.mxu1 %v4485_v7  ;;  %v1901_v7 = vcombine.high %v5211_v60, %v5213_v12  ;;  %v5251_v26 = vpop.f32.mrb[60].mxu0 }
 0x23b   : > { %v5253_v43 = vpop.f32.mrb[61].mxu0 }
 0x23c   : > { %v2080_v44 = vcombine.low %v5251_v26, %v5253_v43  ;;  %v5259_v47 = vpop.f32.mrb[62].mxu0 }
 0x23d   : > { %1794 = vmatmul.mubr.f32.gmra.mrb[78].mxu1 %v5058_v62  ;;  %v2045_v62 = vcombine.high %v5243_v40, %v5245_v41  ;;  %v5261_v48 = vpop.f32.mrb[63].mxu0 }
 0x23e   : > { %v5267_v56 = vpop.f32.mrb[64].mxu0 }
 0x23f   : > { %v5269_v58 = vpop.f32.mrb[65].mxu0 }
 0x240   : > { %v5275_v29 = vpop.f32.mrb[66].mxu0 }
 0x241   : > { %v5277_v63 = vpop.f32.mrb[67].mxu0 }
 0x242   : > { %v5283_v10 = vpop.f32.mrb[68].mxu0 }
 0x243   : > { %v5285_v11 = vpop.f32.mrb[69].mxu0 }
 0x246   : > { %v5295_v17 = vpop.f32.mrb[70].mxu0 }
 0x247   : > { %v5297_v18 = vpop.f32.mrb[71].mxu0 }
 0x24a   : > { %v5311_v31 = vpop.f32.mrb[72].mxu0 }
 0x24b   : > { %v5313_v33 = vpop.f32.mrb[73].mxu0 }
 0x24e   : > { %v5336_v16 = vpop.f32.mrb[74].mxu0 }
 0x24f   : > { %v5339_v25 = vpop.f32.mrb[75].mxu0 }
 0x252   : > { %v5354_v34 = vpop.f32.mrb[76].mxu0 }
 0x253   : > { %v5357_v27 = vpop.f32.mrb[77].mxu0 }
 0x256   : > { %v5372_v22 = vpop.f32.mrb[78].mxu0 }
 0x298   : > { %v4091_v3 = vpop.f32.mrb[32].mxu1 }
 0x299   : > { %v1367_v38 = vsel %vm1351_vm5, %v4091_v3, -inf  ;;  %v1228_v39 = vpop.f32.mrb[33].mxu1  ;;  %v1313_v3 = vadd.s32 40, %v4778_v2 }
 0x29a   : > { %1383 = vst [vmem:[%s5330_s10 + $0x8] sm:$0xff] %v1367_v38  ;;  %v1366_v24 = vsel %vm1350_vm6, %v1228_v39, -inf  ;;  %v1312_v39 = vadd.s32 32, %v4778_v2 }
 0x29b   : > { %1382 = vst [vmem:[%s5330_s10] sm:$0xff] %v1366_v24  ;;  %vm1333_vm11 = vcmp.ne.s32.totalorder %v1313_v3, %v5305_v28 }
 0x29c   : > { %vm1332_vm12 = vcmp.ne.s32.totalorder %v1312_v39, %v5305_v28  ;;  %vm1355_vm13 = vmand %vm1349_vm3, %vm1333_vm11  ;;  %v5375_v39 = vpop.f32.mrb[79].mxu0 }
 0x29d   : > { %vm1354_vm14 = vmand %vm1349_vm3, %vm1332_vm12 }
 0x2a0   : > { %v4094_v38 = vpop.f32.mrb[34].mxu1 }
 0x2a1   : > { %v1369_v1 = vsel %vm1353_vm9, %v4094_v38, -inf  ;;  %v1238_v24 = vpop.f32.mrb[35].mxu1  ;;  %v1315_v38 = vadd.s32 56, %v4778_v2 }
 0x2a2   : > { %1385 = vst [vmem:[%s5330_s10 + $0x18] sm:$0xff] %v1369_v1  ;;  %v1368_v35 = vsel %vm1352_vm10, %v1238_v24, -inf  ;;  %v1314_v1 = vadd.s32 48, %v4778_v2 }
 0x2a3   : > { %1384 = vst [vmem:[%s5330_s10 + $0x10] sm:$0xff] %v1368_v35  ;;  %vm1335_vm15 = vcmp.ne.s32.totalorder %v1315_v38, %v5305_v28 }
 0x2a4   : > { %vm1334_vm0 = vcmp.ne.s32.totalorder %v1314_v1, %v5305_v28  ;;  %vm1357_vm1 = vmand %vm1349_vm3, %vm1335_vm15  ;;  %v1319_v1 = vadd.s32 88, %v4778_v2 }
 0x2a5   : > { %vm1356_vm2 = vmand %vm1349_vm3, %vm1334_vm0 }
 0x2a6   : > { %vm1339_vm8 = vcmp.ne.s32.totalorder %v1319_v1, %v5305_v28  ;;  %v1323_v1 = vadd.s32 120, %v4778_v2 }
 0x2a7   : > { %vm1361_vm10 = vmand %vm1349_vm3, %vm1339_vm8 }
 0x2a8   : > { %v4097_v35 = vpop.f32.mrb[36].mxu1  ;;  %vm1343_vm0 = vcmp.ne.s32.totalorder %v1323_v1, %v5305_v28 }
 0x2a9   : > { %v1371_v3 = vsel %vm1355_vm13, %v4097_v35, -inf  ;;  %v1248_v24 = vpop.f32.mrb[37].mxu1  ;;  %v1317_v35 = vadd.s32 72, %v4778_v2 }
 0x2aa   : > { %1387 = vst [vmem:[%s5330_s10 + $0x28] sm:$0xff] %v1371_v3  ;;  %v1370_v23 = vsel %vm1354_vm14, %v1248_v24, -inf }
 0x2ab   : > { %1386 = vst [vmem:[%s5330_s10 + $0x20] sm:$0xff] %v1370_v23  ;;  %v1316_v23 = vadd.s32 64, %v4778_v2  ;;  %vm1337_vm4 = vcmp.ne.s32.totalorder %v1317_v35, %v5305_v28  ;;  %v1321_v35 = vadd.s32 104, %v4778_v2 }
 0x2ac   : > { %vm1359_vm6 = vmand %vm1349_vm3, %vm1337_vm4 }
 0x2ad   : > { %vm1336_vm5 = vcmp.ne.s32.totalorder %v1316_v23, %v5305_v28  ;;  %vm1341_vm12 = vcmp.ne.s32.totalorder %v1321_v35, %v5305_v28  ;;  %v4487_v35 = vmov 1983009808  }
 0x2ae   : > { %vm1358_vm7 = vmand %vm1349_vm3, %vm1336_vm5 }
 0x2af   : > { %vm1363_vm14 = vmand %vm1349_vm3, %vm1341_vm12 }
 0x2b0   : > { %v4100_v3 = vpop.f32.mrb[38].mxu1 }
 0x2b1   : > { %v1373_v38 = vsel %vm1357_vm1, %v4100_v3, -inf  ;;  %v1258_v24 = vpop.f32.mrb[39].mxu1  ;;  %v1318_v3 = vadd.s32 80, %v4778_v2 }
 0x2b2   : > { %1389 = vst [vmem:[%s5330_s10 + $0x38] sm:$0xff] %v1373_v38  ;;  %v1372_v4 = vsel %vm1356_vm2, %v1258_v24, -inf  ;;  %vm1365_vm2 = vmand %vm1349_vm3, %vm1343_vm0 }
 0x2b3   : > { %1388 = vst [vmem:[%s5330_s10 + $0x30] sm:$0xff] %v1372_v4  ;;  %vm1338_vm9 = vcmp.ne.s32.totalorder %v1318_v3, %v5305_v28 }
 0x2b4   : > { %vm1360_vm11 = vmand %vm1349_vm3, %vm1338_vm9 }
 0x2b8   : > { %v4103_v14 = vpop.f32.mrb[40].mxu1 }
 0x2b9   : > { %v1375_v13 = vsel %vm1359_vm6, %v4103_v14, -inf  ;;  %v1268_v38 = vpop.f32.mrb[41].mxu1  ;;  %v1320_v14 = vadd.s32 96, %v4778_v2 }
 0x2ba   : > { %1391 = vst [vmem:[%s5330_s10 + $0x48] sm:$0xff] %v1375_v13  ;;  %v1374_v4 = vsel %vm1358_vm7, %v1268_v38, -inf }
 0x2bb   : > { %1390 = vst [vmem:[%s5330_s10 + $0x40] sm:$0xff] %v1374_v4  ;;  %vm1340_vm13 = vcmp.ne.s32.totalorder %v1320_v14, %v5305_v28  ;;  %v1322_v4 = vadd.s32 112, %v4778_v2  ;;  %v1869_v14 = vunpack.c.l.s4 %v4487_v35 }
 0x2bc   : > { %vm1362_vm15 = vmand %vm1349_vm3, %vm1340_vm13 }
 0x2bd   : > { %vm1342_vm1 = vcmp.ne.s32.totalorder %v1322_v4, %v5305_v28 }
 0x2be   : > { %vm1364_vm4 = vmand %vm1349_vm3, %vm1342_vm1 }
 0x2c0   : > { %v4106_v23 = vpop.f32.mrb[42].mxu1 }
 0x2c1   : > { %v1377_v24 = vsel %vm1361_vm10, %v4106_v23, -inf  ;;  %v1278_v13 = vpop.f32.mrb[43].mxu1 }
 0x2c2   : > { %1393 = vst [vmem:[%s5330_s10 + $0x58] sm:$0xff] %v1377_v24  ;;  %v1376_v38 = vsel %vm1360_vm11, %v1278_v13, -inf  ;;  %v1870_v13 = vunpack.c.0.s8 %v1869_v14 }
 0x2c3   : > { %1392 = vst [vmem:[%s5330_s10 + $0x50] sm:$0xff] %v1376_v38 }
 0x2c4   : > { %v5431_v1 = vsub.s32 %v1870_v13, %v4778_v2 }
 0x2c6   : > { %v1874_v30 = vrot.slane %v1864_v52, %v5431_v1  ;;  %v1881_v14 = vrot.slane %v1865_v55, %v5431_v1  ;;  %v1910_v42 = vrot.slane %v1900_v15, %v5431_v1  ;;  %v1946_v60 = vrot.slane %v1936_v32, %v5431_v1 }
 0x2c7   : > { %v5467_v12 = vrot.slane %v1937_v37, %v5431_v1 }
 0x2c8   : > { %v4109_v3 = vpop.f32.mrb[44].mxu1 }
 0x2c9   : > { %v1379_v23 = vsel %vm1363_vm14, %v4109_v3, -inf  ;;  %v1288_v5 = vpop.f32.mrb[45].mxu1  ;;  %v4488_v3 = vmov 1966171168  }
 0x2ca   : > { %1395 = vst [vmem:[%s5330_s10 + $0x68] sm:$0xff] %v1379_v23  ;;  %v1378_v24 = vsel %vm1362_vm15, %v1288_v5, -inf  ;;  %v2505_v0 = vunpack.c.l.s4 %v4488_v3 }
 0x2cb   : > { %1394 = vst [vmem:[%s5330_s10 + $0x60] sm:$0xff] %v1378_v24 }
 0x2cc   : > { %v2506_v28 = vunpack.c.0.s8 %v2505_v0 }
 0x2ce   : > { %v5444_v3 = vsub.s32 %v2506_v28, %v4778_v2  ;;  %v1917_v2 = vrot.slane %v1901_v7, %v5431_v1 }
 0x2d0   : > { %v4112_v38 = vpop.f32.mrb[46].mxu1 }
 0x2d1   : > { %v1381_v23 = vsel %vm1365_vm2, %v4112_v38, -inf  ;;  %v1298_v5 = vpop.f32.mrb[47].mxu1 }
 0x2d2   : > { %1397 = vst [vmem:[%s5330_s10 + $0x78] sm:$0xff] %v1381_v23  ;;  %v1380_v24 = vsel %vm1364_vm4, %v1298_v5, -inf }
 0x2d3   : > { %1396 = vst [vmem:[%s5330_s10 + $0x70] sm:$0xff] %v1380_v24 }
 0x2d4   : > { %v1705_v35 = vpop.f32.mrb[48].mxu1 }
 0x2d5   : > { %v1707_v4 = vpop.f32.mrb[49].mxu1 }
 0x2d6   : > { %v1866_v61 = vcombine.low %v1705_v35, %v1707_v4  ;;  %v1867_v59 = vcombine.high %v1705_v35, %v1707_v4 }
 0x2d8   : > { %v1888_v38 = vrot.slane %v1866_v61, %v5431_v1  ;;  %v1895_v13 = vrot.slane %v1867_v59, %v5431_v1  ;;  %v1711_v0 = vpop.f32.mrb[50].mxu1 }
 0x2d9   : > { %v1713_v23 = vpop.f32.mrb[51].mxu1 }
 0x2da   : > { %v1896_v5 = vcombine.low %v1874_v30, %v1888_v38  ;;  %v1897_v24 = vcombine.high %v1874_v30, %v1888_v38  ;;  %v1898_v35 = vcombine.low %v1881_v14, %v1895_v13  ;;  %v1899_v4 = vcombine.high %v1881_v14, %v1895_v13 }
 0x2db   : > { %v1902_v53 = vcombine.low %v1711_v0, %v1713_v23  ;;  %v1903_v52 = vcombine.high %v1711_v0, %v1713_v23 }
 0x2dc   : > { %v2517_v51 = vrot.slane %v1897_v24, %v5444_v3  ;;  %v1717_v45 = vpop.f32.mrb[52].mxu1  ;;  %v2510_v36 = vrot.slane %v1896_v5, %v5444_v3  ;;  %v2524_v14 = vrot.slane %v1898_v35, %v5444_v3 }
 0x2dd   : > { %v1924_v55 = vrot.slane %v1902_v53, %v5431_v1  ;;  %v1931_v59 = vrot.slane %v1903_v52, %v5431_v1  ;;  %v1719_v61 = vpop.f32.mrb[53].mxu1  ;;  %v5483_v52 = vrot.slane %v1972_v50, %v5431_v1 }
 0x2de   : > { %v1938_v28 = vcombine.low %v1717_v45, %v1719_v61  ;;  %v1939_v30 = vcombine.high %v1717_v45, %v1719_v61  ;;  %4145 = vmatprep.mubr.f32.mxu0 %v2510_v36  ;;  %v5489_v36 = vrot.slane %v1973_v57, %v5431_v1 }
 0x2df   : > { %v1932_v38 = vcombine.low %v1910_v42, %v1924_v55  ;;  %v1933_v13 = vcombine.high %v1910_v42, %v1924_v55  ;;  %v1934_v0 = vcombine.low %v1917_v2, %v1931_v59  ;;  %v1935_v23 = vcombine.high %v1917_v2, %v1931_v59  ;;  %4146 = vmatmul.mubr.f32.vlgmr.msra.gmra.mrb[80].mxu0 %v2517_v51 }
 0x2e0   : > { %v1960_v15 = vrot.slane %v1938_v28, %v5431_v1  ;;  %v5471_v7 = vrot.slane %v1939_v30, %v5431_v1  ;;  %v1723_v45 = vpop.f32.mrb[54].mxu1  ;;  %4148 = vmatprep.mubr.f32.mxu0 %v2524_v14  ;;  %v2531_v51 = vrot.slane %v1899_v4, %v5444_v3  ;;  %v5511_v14 = vrot.slane %v2008_v21, %v5431_v1 }
 0x2e1   : > { %v1725_v53 = vpop.f32.mrb[55].mxu1  ;;  %v2538_v5 = vrot.slane %v1932_v38, %v5444_v3  ;;  %v2545_v59 = vrot.slane %v1933_v13, %v5444_v3  ;;  %v2552_v28 = vrot.slane %v1934_v0, %v5444_v3  ;;  %v5517_v38 = vrot.slane %v2009_v8, %v5431_v1 }
 0x2e2   : > { %v1968_v24 = vcombine.low %v1946_v60, %v1960_v15  ;;  %v1969_v32 = vcombine.high %v1946_v60, %v1960_v15  ;;  %v1970_v35 = vcombine.low %v5467_v12, %v5471_v7  ;;  %v1971_v20 = vcombine.high %v5467_v12, %v5471_v7 }
 0x2e3   : > { %v1974_v6 = vcombine.low %v1723_v45, %v1725_v53  ;;  %v1975_v37 = vcombine.high %v1723_v45, %v1725_v53  ;;  %4149 = vmatmul.mubr.f32.gmra.mrb[82].mxu0 %v2531_v51  ;;  %v2559_v15 = vrot.slane %v1935_v23, %v5444_v3  ;;  %v5539_v23 = vrot.slane %v2044_v54, %v5431_v1 }
 0x2e4   : > { %v1729_v4 = vpop.f32.mrb[56].mxu1  ;;  %4151 = vmatprep.mubr.f32.mxu0 %v2538_v5  ;;  %v2566_v21 = vrot.slane %v1968_v24, %v5444_v3  ;;  %v5545_v5 = vrot.slane %v2045_v62, %v5431_v1 }
 0x2e5   : > { %v5492_v42 = vrot.slane %v1974_v6, %v5431_v1  ;;  %v5495_v2 = vrot.slane %v1975_v37, %v5431_v1  ;;  %v1731_v55 = vpop.f32.mrb[57].mxu1 }
 0x2e6   : > { %v2010_v61 = vcombine.low %v1729_v4, %v1731_v55  ;;  %v2011_v50 = vcombine.high %v1729_v4, %v1731_v55 }
 0x2e7   : > { %v2004_v30 = vcombine.low %v5483_v52, %v5492_v42  ;;  %v2005_v46 = vcombine.high %v5483_v52, %v5492_v42  ;;  %v2006_v49 = vcombine.low %v5489_v36, %v5495_v2  ;;  %v2007_v57 = vcombine.high %v5489_v36, %v5495_v2  ;;  %4152 = vmatmul.mubr.f32.gmra.mrb[84].mxu0 %v2545_v59 }
 0x2e8   : > { %v5520_v13 = vrot.slane %v2010_v61, %v5431_v1  ;;  %v5523_v0 = vrot.slane %v2011_v50, %v5431_v1  ;;  %v1735_v60 = vpop.f32.mrb[58].mxu1  ;;  %4154 = vmatprep.mubr.f32.mxu0 %v2552_v28  ;;  %v2573_v52 = vrot.slane %v1969_v32, %v5444_v3  ;;  %v2580_v42 = vrot.slane %v1970_v35, %v5444_v3 }
 0x2e9   : > { %v1737_v12 = vpop.f32.mrb[59].mxu1  ;;  %v5567_v32 = vrot.slane %v2080_v44, %v5431_v1  ;;  %v6036_v35 = vcombine.high %v5251_v26, %v5253_v43  ;;  %v2594_v44 = vrot.slane %v2004_v30, %v5444_v3  ;;  %v6044_v36 = vcombine.high %v5283_v10, %v5285_v11 }
 0x2ea   : > { %v2040_v7 = vcombine.low %v5511_v14, %v5520_v13  ;;  %v2041_v9 = vcombine.high %v5511_v14, %v5520_v13  ;;  %v2042_v19 = vcombine.low %v5517_v38, %v5523_v0  ;;  %v2043_v8 = vcombine.high %v5517_v38, %v5523_v0 }
 0x2eb   : > { %v2046_v45 = vcombine.low %v1735_v60, %v1737_v12  ;;  %v2047_v53 = vcombine.high %v1735_v60, %v1737_v12  ;;  %4155 = vmatmul.mubr.f32.gmra.mrb[86].mxu0 %v2559_v15  ;;  %v5573_v59 = vrot.slane %v6036_v35, %v5431_v1  ;;  %v2587_v12 = vrot.slane %v1971_v20, %v5444_v3 }
 0x2ec   : > { %v1741_v51 = vpop.f32.mrb[60].mxu1  ;;  %4157 = vmatprep.mubr.f32.mxu0 %v2566_v21  ;;  %v6037_v20 = vcombine.low %v5259_v47, %v5261_v48  ;;  %v2601_v35 = vrot.slane %v2005_v46, %v5444_v3  ;;  %v6039_v46 = vcombine.low %v5267_v56, %v5269_v58  ;;  %v5659_v2 = vrot.slane %v6044_v36, %v5431_v1 }
 0x2ed   : > { %v5548_v24 = vrot.slane %v2046_v45, %v5431_v1  ;;  %v5551_v6 = vrot.slane %v2047_v53, %v5431_v1  ;;  %v1743_v37 = vpop.f32.mrb[61].mxu1 }
 0x2ee   : > { %v2082_v4 = vcombine.low %v1741_v51, %v1743_v37  ;;  %v2083_v54 = vcombine.high %v1741_v51, %v1743_v37  ;;  %v5595_v30 = vrot.slane %v6037_v20, %v5431_v1  ;;  %v6038_v37 = vcombine.high %v5259_v47, %v5261_v48 }
 0x2ef   : > { %v2076_v55 = vcombine.low %v5539_v23, %v5548_v24  ;;  %v2077_v40 = vcombine.high %v5539_v23, %v5548_v24  ;;  %v2078_v41 = vcombine.low %v5545_v5, %v5551_v6  ;;  %v2079_v62 = vcombine.high %v5545_v5, %v5551_v6  ;;  %4158 = vmatmul.mubr.f32.gmra.mrb[88].mxu0 %v2573_v52 }
 0x2f0   : > { %v5576_v61 = vrot.slane %v2082_v4, %v5431_v1  ;;  %v5579_v50 = vrot.slane %v2083_v54, %v5431_v1  ;;  %v1747_v28 = vpop.f32.mrb[62].mxu1  ;;  %4160 = vmatprep.mubr.f32.mxu0 %v2580_v42  ;;  %v5601_v52 = vrot.slane %v6038_v37, %v5431_v1 }
 0x2f1   : > { %v1749_v60 = vpop.f32.mrb[63].mxu1  ;;  %v2664_v23 = vrot.slane %v2078_v41, %v5444_v3 }
 0x2f2   : > { %v2112_v15 = vcombine.low %v5567_v32, %v5576_v61  ;;  %v2113_v26 = vcombine.high %v5567_v32, %v5576_v61  ;;  %v2114_v43 = vcombine.low %v5573_v59, %v5579_v50  ;;  %v2115_v21 = vcombine.high %v5573_v59, %v5579_v50 }
 0x2f3   : > { %v2118_v45 = vcombine.low %v1747_v28, %v1749_v60  ;;  %v2119_v53 = vcombine.high %v1747_v28, %v1749_v60  ;;  %4161 = vmatmul.mubr.f32.gmra.mrb[90].mxu0 %v2587_v12  ;;  %v2608_v12 = vrot.slane %v2006_v49, %v5444_v3  ;;  %v6040_v49 = vcombine.high %v5267_v56, %v5269_v58 }
 0x2f4   : > { %v1753_v51 = vpop.f32.mrb[64].mxu1  ;;  %4163 = vmatprep.mubr.f32.mxu0 %v2594_v44  ;;  %v2615_v58 = vrot.slane %v2007_v57, %v5444_v3  ;;  %v2678_v6 = vrot.slane %v2112_v15, %v5444_v3  ;;  %v2692_v15 = vrot.slane %v2114_v43, %v5444_v3  ;;  %v2699_v32 = vrot.slane %v2115_v21, %v5444_v3 }
 0x2f5   : > { %v5604_v4 = vrot.slane %v2118_v45, %v5431_v1  ;;  %v5607_v54 = vrot.slane %v2119_v53, %v5431_v1  ;;  %v1755_v42 = vpop.f32.mrb[65].mxu1  ;;  %v2162_v53 = vrot.slane %v6039_v46, %v5431_v1  ;;  %v2169_v20 = vrot.slane %v6040_v49, %v5431_v1 }
 0x2f6   : > { %v2154_v28 = vcombine.low %v1753_v51, %v1755_v42  ;;  %v2155_v60 = vcombine.high %v1753_v51, %v1755_v42  ;;  %v6042_v46 = vcombine.high %v5275_v29, %v5277_v63 }
 0x2f7   : > { %4164 = vmatmul.mubr.f32.gmra.mrb[92].mxu0 %v2601_v35  ;;  %v6041_v35 = vcombine.low %v5275_v29, %v5277_v63  ;;  %v6043_v29 = vcombine.low %v5283_v10, %v5285_v11  ;;  %v6053_v61 = vcombine.low %v5595_v30, %v5604_v4 }
 0x2f8   : > { %v2176_v51 = vrot.slane %v2154_v28, %v5431_v1  ;;  %v2183_v37 = vrot.slane %v2155_v60, %v5431_v1  ;;  %4166 = vmatprep.mubr.f32.mxu0 %v2608_v12  ;;  %v1759_v42 = vpop.f32.mrb[66].mxu1  ;;  %v5639_v48 = vrot.slane %v6042_v46, %v5431_v1  ;;  %v2622_v28 = vrot.slane %v2040_v7, %v5444_v3 }
 0x2f9   : > { %v5633_v45 = vrot.slane %v6041_v35, %v5431_v1  ;;  %v1761_v56 = vpop.f32.mrb[67].mxu1  ;;  %v5653_v63 = vrot.slane %v6043_v29, %v5431_v1  ;;  %v2629_v46 = vrot.slane %v2041_v9, %v5444_v3 }
 0x2fa   : > { %v2184_v60 = vcombine.low %v2162_v53, %v2176_v51  ;;  %v2185_v12 = vcombine.high %v2162_v53, %v2176_v51  ;;  %v2186_v49 = vcombine.low %v2169_v20, %v2183_v37  ;;  %v2187_v35 = vcombine.high %v2169_v20, %v2183_v37 }
 0x2fb   : > { %v2190_v47 = vcombine.low %v1759_v42, %v1761_v56  ;;  %v2191_v44 = vcombine.high %v1759_v42, %v1761_v56  ;;  %4167 = vmatmul.mubr.f32.gmra.mrb[94].mxu0 %v2615_v58  ;;  %v6045_v20 = vcombine.low %v5295_v17, %v5297_v18  ;;  %v6046_v37 = vcombine.high %v5295_v17, %v5297_v18 }
 0x2fc   : > { %v2741_v57 = vrot.slane %v2185_v12, %v5444_v3  ;;  %4169 = vmatprep.mubr.f32.mxu0 %v2622_v28  ;;  %v2734_v7 = vrot.slane %v2184_v60, %v5444_v3  ;;  %v1765_v53 = vpop.f32.mrb[68].mxu1  ;;  %v6047_v58 = vcombine.low %v5311_v31, %v5313_v33  ;;  %v2636_v17 = vrot.slane %v2042_v19, %v5444_v3 }
 0x2fd   : > { %v5667_v51 = vrot.slane %v6045_v20, %v5431_v1  ;;  %v5673_v42 = vrot.slane %v6046_v37, %v5431_v1  ;;  %v2212_v10 = vrot.slane %v2190_v47, %v5431_v1  ;;  %v5677_v11 = vrot.slane %v2191_v44, %v5431_v1  ;;  %v1767_v56 = vpop.f32.mrb[69].mxu1 }
 0x2fe   : > { %v5687_v28 = vrot.slane %v6047_v58, %v5431_v1  ;;  %4193 = vmatprep.mubr.f32.mxu1 %v2734_v7  ;;  %v2748_v18 = vrot.slane %v2186_v49, %v5444_v3  ;;  %v2226_v44 = vcombine.low %v1765_v53, %v1767_v56  ;;  %v2227_v47 = vcombine.high %v1765_v53, %v1767_v56 }
 0x2ff   : > { %v2220_v14 = vcombine.low %v5633_v45, %v2212_v10  ;;  %v2221_v13 = vcombine.high %v5633_v45, %v2212_v10  ;;  %v2222_v9 = vcombine.low %v5639_v48, %v5677_v11  ;;  %v2223_v60 = vcombine.high %v5639_v48, %v5677_v11  ;;  %4170 = vmatmul.mubr.f32.gmra.mrb[96].mxu0 %v2629_v46 }
 0x300   : > { %4194 = vmatmul.mubr.f32.vlgmr.msra.gmra.mrb[80].mxu1 %v2741_v57  ;;  %4172 = vmatprep.mubr.f32.mxu0 %v2636_v17  ;;  %v5701_v12 = vrot.slane %v2226_v44, %v5431_v1  ;;  %v5704_v19 = vrot.slane %v2227_v47, %v5431_v1  ;;  %v1771_v49 = vpop.f32.mrb[70].mxu1  ;;  %v6048_v45 = vcombine.high %v5311_v31, %v5313_v33 }
 0x301   : > { %4196 = vmatprep.mubr.f32.mxu1 %v2748_v18  ;;  %v2643_v48 = vrot.slane %v2043_v8, %v5444_v3  ;;  %v2755_v36 = vrot.slane %v2187_v35, %v5444_v3  ;;  %v2650_v57 = vrot.slane %v2076_v55, %v5444_v3  ;;  %v2762_v7 = vrot.slane %v2220_v14, %v5444_v3  ;;  %v1773_v53 = vpop.f32.mrb[71].mxu1 }
 0x302   : > { %v5710_v29 = vrot.slane %v6048_v45, %v5431_v1  ;;  %v2256_v31 = vcombine.low %v5653_v63, %v5701_v12  ;;  %v2257_v33 = vcombine.high %v5653_v63, %v5701_v12  ;;  %v2258_v38 = vcombine.low %v5659_v2, %v5704_v19 }
 0x303   : > { %v2259_v0 = vcombine.high %v5659_v2, %v5704_v19  ;;  %4173 = vmatmul.mubr.f32.gmra.mrb[98].mxu0 %v2643_v48  ;;  %v2262_v8 = vcombine.low %v1771_v49, %v1773_v53  ;;  %v2263_v35 = vcombine.high %v1771_v49, %v1773_v53  ;;  %v6049_v55 = vcombine.low %v5336_v16, %v5339_v25 }
 0x304   : > { %v6050_v37 = vcombine.high %v5336_v16, %v5339_v25  ;;  %4197 = vmatmul.mubr.f32.gmra.mrb[82].mxu1 %v2755_v36  ;;  %4175 = vmatprep.mubr.f32.mxu0 %v2650_v57  ;;  %v2657_v2 = vrot.slane %v2077_v40, %v5444_v3  ;;  %v1777_v10 = vpop.f32.mrb[72].mxu1  ;;  %v6051_v11 = vcombine.low %v5354_v34, %v5357_v27 }
 0x305   : > { %v5734_v20 = vrot.slane %v6049_v55, %v5431_v1  ;;  %v6052_v16 = vcombine.high %v5354_v34, %v5357_v27  ;;  %4199 = vmatprep.mubr.f32.mxu1 %v2762_v7  ;;  %v5763_v24 = vrot.slane %v2262_v8, %v5431_v1  ;;  %v5766_v40 = vrot.slane %v2263_v35, %v5431_v1  ;;  %v1779_v34 = vpop.f32.mrb[73].mxu1 }
 0x306   : > { %v5740_v63 = vrot.slane %v6050_v37, %v5431_v1  ;;  %v5750_v46 = vrot.slane %v6051_v11, %v5431_v1  ;;  %v2671_v56 = vrot.slane %v2079_v62, %v5444_v3  ;;  %v2769_v27 = vrot.slane %v2221_v13, %v5444_v3 }
 0x307   : > { %v5756_v25 = vrot.slane %v6052_v16, %v5431_v1  ;;  %v2776_v58 = vrot.slane %v2222_v9, %v5444_v3  ;;  %v2298_v17 = vcombine.low %v1777_v10, %v1779_v34  ;;  %v2299_v18 = vcombine.high %v1777_v10, %v1779_v34  ;;  %4176 = vmatmul.mubr.f32.gmra.mrb[100].mxu0 %v2657_v2 }
 0x308   : > { %v2292_v41 = vcombine.low %v5667_v51, %v5763_v24  ;;  %v2293_v44 = vcombine.high %v5667_v51, %v5763_v24  ;;  %v2294_v47 = vcombine.low %v5673_v42, %v5766_v40  ;;  %v2295_v5 = vcombine.high %v5673_v42, %v5766_v40  ;;  %4200 = vmatmul.mubr.f32.gmra.mrb[84].mxu1 %v2769_v27  ;;  %v1783_v13 = vpop.f32.mrb[74].mxu1 }
 0x309   : > { %4178 = vmatprep.mubr.f32.mxu0 %v2664_v23  ;;  %v2320_v62 = vrot.slane %v2298_v17, %v5431_v1  ;;  %v2327_v14 = vrot.slane %v2299_v18, %v5431_v1  ;;  %4202 = vmatprep.mubr.f32.mxu1 %v2776_v58  ;;  %v2783_v9 = vrot.slane %v2223_v60, %v5444_v3  ;;  %v1785_v49 = vpop.f32.mrb[75].mxu1 }
 0x30a   : > { %v2790_v12 = vrot.slane %v2256_v31, %v5444_v3  ;;  %v2685_v19 = vrot.slane %v2113_v26, %v5444_v3  ;;  %v2706_v26 = vrot.slane %v6053_v61, %v5444_v3  ;;  %v2334_v43 = vcombine.low %v1783_v13, %v1785_v49 }
 0x30b   : > { %v2328_v45 = vcombine.low %v5687_v28, %v2320_v62  ;;  %v2329_v48 = vcombine.high %v5687_v28, %v2320_v62  ;;  %v2330_v36 = vcombine.low %v5710_v29, %v2327_v14  ;;  %v2331_v60 = vcombine.high %v5710_v29, %v2327_v14  ;;  %4179 = vmatmul.mubr.f32.gmra.mrb[102].mxu0 %v2671_v56 }
 0x30c   : > { %v2335_v57 = vcombine.high %v1783_v13, %v1785_v49  ;;  %4203 = vmatmul.mubr.f32.gmra.mrb[86].mxu1 %v2783_v9  ;;  %4181 = vmatprep.mubr.f32.mxu0 %v2678_v6  ;;  %v1789_v59 = vpop.f32.mrb[76].mxu1  ;;  %v2797_v50 = vrot.slane %v2257_v33, %v5444_v3  ;;  %v2356_v21 = vrot.slane %v2334_v43, %v5431_v1 }
 0x30d   : > { %v5811_v28 = vrot.slane %v2328_v45, %v5444_v3  ;;  %v5814_v29 = vrot.slane %v2329_v48, %v5444_v3  ;;  %v5817_v7 = vrot.slane %v2330_v36, %v5444_v3  ;;  %4205 = vmatprep.mubr.f32.mxu1 %v2790_v12  ;;  %v1791_v31 = vpop.f32.mrb[77].mxu1  ;;  %v2867_v8 = vrot.slane %v2331_v60, %v5444_v3 }
 0x30e   : > { %v2363_v53 = vrot.slane %v2335_v57, %v5431_v1  ;;  %v2804_v35 = vrot.slane %v2258_v38, %v5444_v3  ;;  %v2811_v55 = vrot.slane %v2259_v0, %v5444_v3  ;;  %v2370_v37 = vcombine.low %v1789_v59, %v1791_v31 }
 0x30f   : > { %v2371_v2 = vcombine.high %v1789_v59, %v1791_v31  ;;  %4182 = vmatmul.mubr.f32.gmra.mrb[104].mxu0 %v2685_v19  ;;  %v2364_v10 = vcombine.low %v5734_v20, %v2356_v21  ;;  %v2365_v11 = vcombine.high %v5734_v20, %v2356_v21  ;;  %v2818_v23 = vrot.slane %v2292_v41, %v5444_v3 }
 0x310   : > { %v2366_v33 = vcombine.low %v5740_v63, %v2363_v53  ;;  %v2367_v16 = vcombine.high %v5740_v63, %v2363_v53  ;;  %4206 = vmatmul.mubr.f32.gmra.mrb[88].mxu1 %v2797_v50  ;;  %4184 = vmatprep.mubr.f32.mxu0 %v2692_v15  ;;  %v2392_v56 = vrot.slane %v2370_v37, %v5431_v1  ;;  %v1795_v0 = vpop.f32.mrb[78].mxu1 }
 0x311   : > { %v2399_v38 = vrot.slane %v2371_v2, %v5431_v1  ;;  %4208 = vmatprep.mubr.f32.mxu1 %v2804_v35  ;;  %v2874_v34 = vrot.slane %v2364_v10, %v5444_v3  ;;  %v2881_v27 = vrot.slane %v2365_v11, %v5444_v3  ;;  %v1797_v58 = vpop.f32.mrb[79].mxu1  ;;  %v6054_v62 = vcombine.low %v5372_v22, %v5375_v39 }
 0x312   : > { %v2888_v20 = vrot.slane %v2366_v33, %v5444_v3  ;;  %v2895_v17 = vrot.slane %v2367_v16, %v5444_v3  ;;  %v2400_v63 = vcombine.low %v5750_v46, %v2392_v56  ;;  %v2401_v18 = vcombine.high %v5750_v46, %v2392_v56 }
 0x313   : > { %v2402_v41 = vcombine.low %v5756_v25, %v2399_v38  ;;  %v2403_v6 = vcombine.high %v5756_v25, %v2399_v38  ;;  %4185 = vmatmul.mubr.f32.gmra.mrb[106].mxu0 %v2699_v32  ;;  %v2414_v14 = vrot.slane %v6054_v62, %v5431_v1  ;;  %v6055_v13 = vcombine.high %v5372_v22, %v5375_v39 }
 0x314   : > { %v2406_v12 = vcombine.low %v1795_v0, %v1797_v58  ;;  %v2407_v19 = vcombine.high %v1795_v0, %v1797_v58  ;;  %4209 = vmatmul.mubr.f32.gmra.mrb[90].mxu1 %v2811_v55  ;;  %4187 = vmatprep.mubr.f32.mxu0 %v2706_v26  ;;  %v2902_v46 = vrot.slane %v2400_v63, %v5444_v3 }
 0x315   : > { %v2421_v9 = vrot.slane %v6055_v13, %v5431_v1  ;;  %v2909_v15 = vrot.slane %v2401_v18, %v5444_v3  ;;  %v2916_v25 = vrot.slane %v2402_v41, %v5444_v3  ;;  %4211 = vmatprep.mubr.f32.mxu1 %v2818_v23  ;;  %v6056_v49 = vcombine.high %v5595_v30, %v5604_v4 }
 0x316   : > { %v2428_v48 = vrot.slane %v2406_v12, %v5431_v1  ;;  %v2435_v22 = vrot.slane %v2407_v19, %v5431_v1  ;;  %v2923_v39 = vrot.slane %v2403_v6, %v5444_v3  ;;  %v2825_v36 = vrot.slane %v2293_v44, %v5444_v3 }
 0x317   : > { %v2713_v45 = vrot.slane %v6056_v49, %v5444_v3  ;;  %v6057_v60 = vcombine.low %v5601_v52, %v5607_v54  ;;  %v2832_v30 = vrot.slane %v2294_v47, %v5444_v3  ;;  %v6058_v51 = vcombine.high %v5601_v52, %v5607_v54 }
 0x318   : > { %v2436_v4 = vcombine.low %v2414_v14, %v2428_v48  ;;  %v2437_v1 = vcombine.high %v2414_v14, %v2428_v48  ;;  %v2438_v61 = vcombine.low %v2421_v9, %v2435_v22  ;;  %v2439_v26 = vcombine.high %v2421_v9, %v2435_v22  ;;  %4212 = vmatmul.mubr.f32.gmra.mrb[92].mxu1 %v2825_v36 }
 0x319   : > { %v2720_v32 = vrot.slane %v6057_v60, %v5444_v3  ;;  %4188 = vmatmul.mubr.f32.gmra.mrb[108].mxu0 %v2713_v45  ;;  %v2727_v24 = vrot.slane %v6058_v51, %v5444_v3  ;;  %4214 = vmatprep.mubr.f32.mxu1 %v2832_v30  ;;  %v2839_v59 = vrot.slane %v2295_v5, %v5444_v3 }
 0x31a   : > { %v2930_v44 = vrot.slane %v2436_v4, %v5444_v3  ;;  %v2937_v43 = vrot.slane %v2437_v1, %v5444_v3  ;;  %v2944_v57 = vrot.slane %v2438_v61, %v5444_v3  ;;  %v2951_v47 = vrot.slane %v2439_v26, %v5444_v3 }
 0x31b   : > { %4190 = vmatprep.mubr.f32.mxu0 %v2720_v32 }
 0x31c   : > { %4215 = vmatmul.mubr.f32.gmra.mrb[94].mxu1 %v2839_v59 }
 0x31d   : > { %4191 = vmatmul.mubr.f32.gmra.mrb[110].mxu0 %v2727_v24  ;;  %4217 = vmatprep.mubr.f32.mxu1 %v5811_v28 }
 0x320   : > { %4218 = vmatmul.mubr.f32.gmra.mrb[96].mxu1 %v5814_v29 }
 0x321   : > { %4220 = vmatprep.mubr.f32.mxu1 %v5817_v7 }
 0x324   : > { %4221 = vmatmul.mubr.f32.gmra.mrb[98].mxu1 %v2867_v8 }
 0x325   : > { %4223 = vmatprep.mubr.f32.mxu1 %v2874_v34 }
 0x328   : > { %4224 = vmatmul.mubr.f32.gmra.mrb[100].mxu1 %v2881_v27 }
 0x329   : > { %4226 = vmatprep.mubr.f32.mxu1 %v2888_v20 }
 0x32c   : > { %4227 = vmatmul.mubr.f32.gmra.mrb[102].mxu1 %v2895_v17 }
 0x32d   : > { %4229 = vmatprep.mubr.f32.mxu1 %v2902_v46 }
 0x330   : > { %4230 = vmatmul.mubr.f32.gmra.mrb[104].mxu1 %v2909_v15 }
 0x331   : > { %4232 = vmatprep.mubr.f32.mxu1 %v2916_v25 }
 0x334   : > { %4233 = vmatmul.mubr.f32.gmra.mrb[106].mxu1 %v2923_v39 }
 0x335   : > { %4235 = vmatprep.mubr.f32.mxu1 %v2930_v44 }
 0x338   : > { %4236 = vmatmul.mubr.f32.gmra.mrb[108].mxu1 %v2937_v43 }
 0x339   : > { %4238 = vmatprep.mubr.f32.mxu1 %v2944_v57 }
 0x33c   : > { %4239 = vmatmul.mubr.f32.gmra.mrb[110].mxu1 %v2951_v47 }
 0x3b2   : > { %v4147_v3 = vpop.f32.mrb[80].mxu0 }
 0x3b3   : > { %v3418_v52 = vcombine.high %v4147_v3, %v4147_v3  ;;  %3547 = vst [vmem:[%s5889_s13 + $0x8] sm:$0xf] %v4147_v3  ;;  %v3034_v54 = vpop.f32.mrb[81].mxu0 }
 0x3b4   : > { %v3417_v42 = vcombine.high %v3034_v54, %v3034_v54  ;;  %3545 = vst [vmem:[%s5889_s13] sm:$0xf] %v3034_v54 }
 0x3b5   : > { %3548 = vst [vmem:[%s5889_s13 + $0xc] sm:$0xf] %v3418_v52 }
 0x3b6   : > { %3546 = vst [vmem:[%s5889_s13 + $0x4] sm:$0xf] %v3417_v42  ;;  %v4150_v40 = vpop.f32.mrb[82].mxu0 }
 0x3b7   : > { %v3420_v5 = vcombine.high %v4150_v40, %v4150_v40  ;;  %3551 = vst [vmem:[%s5889_s13 + $0x18] sm:$0xf] %v4150_v40  ;;  %v3044_v28 = vpop.f32.mrb[83].mxu0 }
 0x3b8   : > { %v3419_v29 = vcombine.high %v3044_v28, %v3044_v28  ;;  %3549 = vst [vmem:[%s5889_s13 + $0x10] sm:$0xf] %v3044_v28 }
 0x3b9   : > { %3552 = vst [vmem:[%s5889_s13 + $0x1c] sm:$0xf] %v3420_v5 }
 0x3ba   : > { %3550 = vst [vmem:[%s5889_s13 + $0x14] sm:$0xf] %v3419_v29  ;;  %v4153_v7 = vpop.f32.mrb[84].mxu0 }
 0x3bb   : > { %v3422_v50 = vcombine.high %v4153_v7, %v4153_v7  ;;  %3555 = vst [vmem:[%s5889_s13 + $0x28] sm:$0xf] %v4153_v7  ;;  %v3054_v21 = vpop.f32.mrb[85].mxu0 }
 0x3bc   : > { %v3421_v53 = vcombine.high %v3054_v21, %v3054_v21  ;;  %3553 = vst [vmem:[%s5889_s13 + $0x20] sm:$0xf] %v3054_v21 }
 0x3bd   : > { %3556 = vst [vmem:[%s5889_s13 + $0x2c] sm:$0xf] %v3422_v50 }
 0x3be   : > { %3554 = vst [vmem:[%s5889_s13 + $0x24] sm:$0xf] %v3421_v53  ;;  %v4156_v31 = vpop.f32.mrb[86].mxu0 }
 0x3bf   : > { %v3424_v8 = vcombine.high %v4156_v31, %v4156_v31  ;;  %3559 = vst [vmem:[%s5889_s13 + $0x38] sm:$0xf] %v4156_v31  ;;  %v3064_v35 = vpop.f32.mrb[87].mxu0 }
 0x3c0   : > { %v3423_v55 = vcombine.high %v3064_v35, %v3064_v35  ;;  %3557 = vst [vmem:[%s5889_s13 + $0x30] sm:$0xf] %v3064_v35 }
 0x3c1   : > { %3560 = vst [vmem:[%s5889_s13 + $0x3c] sm:$0xf] %v3424_v8 }
 0x3c2   : > { %3558 = vst [vmem:[%s5889_s13 + $0x34] sm:$0xf] %v3423_v55  ;;  %v4159_v37 = vpop.f32.mrb[88].mxu0 }
 0x3c3   : > { %v3426_v2 = vcombine.high %v4159_v37, %v4159_v37  ;;  %3563 = vst [vmem:[%s5889_s13 + $0x48] sm:$0xf] %v4159_v37  ;;  %v3074_v10 = vpop.f32.mrb[89].mxu0 }
 0x3c4   : > { %v3425_v11 = vcombine.high %v3074_v10, %v3074_v10  ;;  %3561 = vst [vmem:[%s5889_s13 + $0x40] sm:$0xf] %v3074_v10 }
 0x3c5   : > { %3564 = vst [vmem:[%s5889_s13 + $0x4c] sm:$0xf] %v3426_v2 }
 0x3c6   : > { %3562 = vst [vmem:[%s5889_s13 + $0x44] sm:$0xf] %v3425_v11  ;;  %v4162_v33 = vpop.f32.mrb[90].mxu0 }
 0x3c7   : > { %v3428_v16 = vcombine.high %v4162_v33, %v4162_v33  ;;  %3567 = vst [vmem:[%s5889_s13 + $0x58] sm:$0xf] %v4162_v33  ;;  %v3084_v23 = vpop.f32.mrb[91].mxu0 }
 0x3c8   : > { %v3427_v56 = vcombine.high %v3084_v23, %v3084_v23  ;;  %3565 = vst [vmem:[%s5889_s13 + $0x50] sm:$0xf] %v3084_v23 }
 0x3c9   : > { %3568 = vst [vmem:[%s5889_s13 + $0x5c] sm:$0xf] %v3428_v16 }
 0x3ca   : > { %3566 = vst [vmem:[%s5889_s13 + $0x54] sm:$0xf] %v3427_v56  ;;  %v4165_v38 = vpop.f32.mrb[92].mxu0 }
 0x3cb   : > { %v3430_v0 = vcombine.high %v4165_v38, %v4165_v38  ;;  %3571 = vst [vmem:[%s5889_s13 + $0x68] sm:$0xf] %v4165_v38  ;;  %v3094_v34 = vpop.f32.mrb[93].mxu0 }
 0x3cc   : > { %v3429_v27 = vcombine.high %v3094_v34, %v3094_v34  ;;  %3569 = vst [vmem:[%s5889_s13 + $0x60] sm:$0xf] %v3094_v34 }
 0x3cd   : > { %3572 = vst [vmem:[%s5889_s13 + $0x6c] sm:$0xf] %v3430_v0 }
 0x3ce   : > { %3570 = vst [vmem:[%s5889_s13 + $0x64] sm:$0xf] %v3429_v27  ;;  %v4168_v20 = vpop.f32.mrb[94].mxu0 }
 0x3cf   : > { %v3432_v58 = vcombine.high %v4168_v20, %v4168_v20  ;;  %3575 = vst [vmem:[%s5889_s13 + $0x78] sm:$0xf] %v4168_v20  ;;  %v3104_v17 = vpop.f32.mrb[95].mxu0 }
 0x3d0   : > { %v3431_v63 = vcombine.high %v3104_v17, %v3104_v17  ;;  %3573 = vst [vmem:[%s5889_s13 + $0x70] sm:$0xf] %v3104_v17 }
 0x3d1   : > { %3576 = vst [vmem:[%s5889_s13 + $0x7c] sm:$0xf] %v3432_v58 }
 0x3d2   : > { %3574 = vst [vmem:[%s5889_s13 + $0x74] sm:$0xf] %v3431_v63  ;;  %v4171_v18 = vpop.f32.mrb[96].mxu0 }
 0x3d3   : > { %v3434_v41 = vcombine.high %v4171_v18, %v4171_v18  ;;  %3579 = vst [vmem:[%s5889_s13 + $0x88] sm:$0xf] %v4171_v18  ;;  %v4195_v6 = vpop.f32.mrb[80].mxu1  ;;  %v3114_v62 = vpop.f32.mrb[97].mxu0 }
 0x3d4   : > { %v3450_v14 = vcombine.high %v4195_v6, %v4195_v6  ;;  %3611 = vst [vmem:[%s5889_s13 + $0x108] sm:$0xf] %v4195_v6  ;;  %v3433_v13 = vcombine.high %v3114_v62, %v3114_v62  ;;  %3577 = vst [vmem:[%s5889_s13 + $0x80] sm:$0xf] %v3114_v62  ;;  %v3194_v9 = vpop.f32.mrb[81].mxu1 }
 0x3d5   : > { %3580 = vst [vmem:[%s5889_s13 + $0x8c] sm:$0xf] %v3434_v41  ;;  %v3449_v12 = vcombine.high %v3194_v9, %v3194_v9  ;;  %3609 = vst [vmem:[%s5889_s13 + $0x100] sm:$0xf] %v3194_v9 }
 0x3d6   : > { %3612 = vst [vmem:[%s5889_s13 + $0x10c] sm:$0xf] %v3450_v14  ;;  %3578 = vst [vmem:[%s5889_s13 + $0x84] sm:$0xf] %v3433_v13  ;;  %v4174_v19 = vpop.f32.mrb[98].mxu0 }
 0x3d7   : > { %3610 = vst [vmem:[%s5889_s13 + $0x104] sm:$0xf] %v3449_v12  ;;  %v3436_v46 = vcombine.high %v4174_v19, %v4174_v19  ;;  %3583 = vst [vmem:[%s5889_s13 + $0x98] sm:$0xf] %v4174_v19  ;;  %v4198_v15 = vpop.f32.mrb[82].mxu1  ;;  %v3124_v25 = vpop.f32.mrb[99].mxu0 }
 0x3d8   : > { %v3452_v49 = vcombine.high %v4198_v15, %v4198_v15  ;;  %3615 = vst [vmem:[%s5889_s13 + $0x118] sm:$0xf] %v4198_v15  ;;  %v3435_v45 = vcombine.high %v3124_v25, %v3124_v25  ;;  %3581 = vst [vmem:[%s5889_s13 + $0x90] sm:$0xf] %v3124_v25  ;;  %v3204_v48 = vpop.f32.mrb[83].mxu1 }
 0x3d9   : > { %3584 = vst [vmem:[%s5889_s13 + $0x9c] sm:$0xf] %v3436_v46  ;;  %v3451_v22 = vcombine.high %v3204_v48, %v3204_v48  ;;  %3613 = vst [vmem:[%s5889_s13 + $0x110] sm:$0xf] %v3204_v48 }
 0x3da   : > { %3616 = vst [vmem:[%s5889_s13 + $0x11c] sm:$0xf] %v3452_v49  ;;  %3582 = vst [vmem:[%s5889_s13 + $0x94] sm:$0xf] %v3435_v45  ;;  %v4177_v39 = vpop.f32.mrb[100].mxu0 }
 0x3db   : > { %3614 = vst [vmem:[%s5889_s13 + $0x114] sm:$0xf] %v3451_v22  ;;  %v3438_v36 = vcombine.high %v4177_v39, %v4177_v39  ;;  %3587 = vst [vmem:[%s5889_s13 + $0xa8] sm:$0xf] %v4177_v39  ;;  %v4201_v60 = vpop.f32.mrb[84].mxu1  ;;  %v3134_v32 = vpop.f32.mrb[101].mxu0 }
 0x3dc   : > { %v3454_v30 = vcombine.high %v4201_v60, %v4201_v60  ;;  %3619 = vst [vmem:[%s5889_s13 + $0x128] sm:$0xf] %v4201_v60  ;;  %v3437_v4 = vcombine.high %v3134_v32, %v3134_v32  ;;  %3585 = vst [vmem:[%s5889_s13 + $0xa0] sm:$0xf] %v3134_v32  ;;  %v3214_v1 = vpop.f32.mrb[85].mxu1 }
 0x3dd   : > { %3588 = vst [vmem:[%s5889_s13 + $0xac] sm:$0xf] %v3438_v36  ;;  %v3453_v61 = vcombine.high %v3214_v1, %v3214_v1  ;;  %3617 = vst [vmem:[%s5889_s13 + $0x120] sm:$0xf] %v3214_v1 }
 0x3de   : > { %3620 = vst [vmem:[%s5889_s13 + $0x12c] sm:$0xf] %v3454_v30  ;;  %3586 = vst [vmem:[%s5889_s13 + $0xa4] sm:$0xf] %v3437_v4  ;;  %v4180_v26 = vpop.f32.mrb[102].mxu0 }
 0x3df   : > { %3618 = vst [vmem:[%s5889_s13 + $0x124] sm:$0xf] %v3453_v61  ;;  %v3440_v51 = vcombine.high %v4180_v26, %v4180_v26  ;;  %3591 = vst [vmem:[%s5889_s13 + $0xb8] sm:$0xf] %v4180_v26  ;;  %v4204_v24 = vpop.f32.mrb[86].mxu1  ;;  %v3144_v44 = vpop.f32.mrb[103].mxu0 }
 0x3e0   : > { %v3456_v43 = vcombine.high %v4204_v24, %v4204_v24  ;;  %3623 = vst [vmem:[%s5889_s13 + $0x138] sm:$0xf] %v4204_v24  ;;  %v3439_v57 = vcombine.high %v3144_v44, %v3144_v44  ;;  %3589 = vst [vmem:[%s5889_s13 + $0xb0] sm:$0xf] %v3144_v44  ;;  %v3224_v47 = vpop.f32.mrb[87].mxu1 }
 0x3e1   : > { %3592 = vst [vmem:[%s5889_s13 + $0xbc] sm:$0xf] %v3440_v51  ;;  %v3455_v59 = vcombine.high %v3224_v47, %v3224_v47  ;;  %3621 = vst [vmem:[%s5889_s13 + $0x130] sm:$0xf] %v3224_v47 }
 0x3e2   : > { %3624 = vst [vmem:[%s5889_s13 + $0x13c] sm:$0xf] %v3456_v43  ;;  %3590 = vst [vmem:[%s5889_s13 + $0xb4] sm:$0xf] %v3439_v57  ;;  %v4183_v3 = vpop.f32.mrb[104].mxu0 }
 0x3e3   : > { %3622 = vst [vmem:[%s5889_s13 + $0x134] sm:$0xf] %v3455_v59  ;;  %v3442_v52 = vcombine.high %v4183_v3, %v4183_v3  ;;  %3595 = vst [vmem:[%s5889_s13 + $0xc8] sm:$0xf] %v4183_v3  ;;  %v4207_v54 = vpop.f32.mrb[88].mxu1  ;;  %v3154_v42 = vpop.f32.mrb[105].mxu0 }
 0x3e4   : > { %v3458_v40 = vcombine.high %v4207_v54, %v4207_v54  ;;  %3627 = vst [vmem:[%s5889_s13 + $0x148] sm:$0xf] %v4207_v54  ;;  %v3441_v5 = vcombine.high %v3154_v42, %v3154_v42  ;;  %3593 = vst [vmem:[%s5889_s13 + $0xc0] sm:$0xf] %v3154_v42  ;;  %v3234_v28 = vpop.f32.mrb[89].mxu1 }
 0x3e5   : > { %3596 = vst [vmem:[%s5889_s13 + $0xcc] sm:$0xf] %v3442_v52  ;;  %v3457_v29 = vcombine.high %v3234_v28, %v3234_v28  ;;  %3625 = vst [vmem:[%s5889_s13 + $0x140] sm:$0xf] %v3234_v28 }
 0x3e6   : > { %3628 = vst [vmem:[%s5889_s13 + $0x14c] sm:$0xf] %v3458_v40  ;;  %3594 = vst [vmem:[%s5889_s13 + $0xc4] sm:$0xf] %v3441_v5  ;;  %v4186_v7 = vpop.f32.mrb[106].mxu0 }
 0x3e7   : > { %3626 = vst [vmem:[%s5889_s13 + $0x144] sm:$0xf] %v3457_v29  ;;  %v3444_v50 = vcombine.high %v4186_v7, %v4186_v7  ;;  %3599 = vst [vmem:[%s5889_s13 + $0xd8] sm:$0xf] %v4186_v7  ;;  %v4210_v21 = vpop.f32.mrb[90].mxu1  ;;  %v3164_v53 = vpop.f32.mrb[107].mxu0 }
 0x3e8   : > { %v3460_v31 = vcombine.high %v4210_v21, %v4210_v21  ;;  %3631 = vst [vmem:[%s5889_s13 + $0x158] sm:$0xf] %v4210_v21  ;;  %v3443_v8 = vcombine.high %v3164_v53, %v3164_v53  ;;  %3597 = vst [vmem:[%s5889_s13 + $0xd0] sm:$0xf] %v3164_v53  ;;  %v3244_v35 = vpop.f32.mrb[91].mxu1 }
 0x3e9   : > { %3600 = vst [vmem:[%s5889_s13 + $0xdc] sm:$0xf] %v3444_v50  ;;  %v3459_v55 = vcombine.high %v3244_v35, %v3244_v35  ;;  %3629 = vst [vmem:[%s5889_s13 + $0x150] sm:$0xf] %v3244_v35 }
 0x3ea   : > { %3632 = vst [vmem:[%s5889_s13 + $0x15c] sm:$0xf] %v3460_v31  ;;  %3598 = vst [vmem:[%s5889_s13 + $0xd4] sm:$0xf] %v3443_v8 }
 0x3eb   : > { %3630 = vst [vmem:[%s5889_s13 + $0x154] sm:$0xf] %v3459_v55  ;;  %v4213_v10 = vpop.f32.mrb[92].mxu1 }
 0x3ec   : > { %v4189_v37 = vpop.f32.mrb[108].mxu0  ;;  %v3462_v33 = vcombine.high %v4213_v10, %v4213_v10  ;;  %3635 = vst [vmem:[%s5889_s13 + $0x168] sm:$0xf] %v4213_v10  ;;  %v3254_v23 = vpop.f32.mrb[93].mxu1 }
 0x3ed   : > { %v3446_v2 = vcombine.high %v4189_v37, %v4189_v37  ;;  %3603 = vst [vmem:[%s5889_s13 + $0xe8] sm:$0xf] %v4189_v37  ;;  %v3174_v11 = vpop.f32.mrb[109].mxu0  ;;  %v3461_v56 = vcombine.high %v3254_v23, %v3254_v23  ;;  %3633 = vst [vmem:[%s5889_s13 + $0x160] sm:$0xf] %v3254_v23 }
 0x3ee   : > { %v3445_v16 = vcombine.high %v3174_v11, %v3174_v11  ;;  %3601 = vst [vmem:[%s5889_s13 + $0xe0] sm:$0xf] %v3174_v11  ;;  %3636 = vst [vmem:[%s5889_s13 + $0x16c] sm:$0xf] %v3462_v33 }
 0x3ef   : > { %3604 = vst [vmem:[%s5889_s13 + $0xec] sm:$0xf] %v3446_v2  ;;  %3634 = vst [vmem:[%s5889_s13 + $0x164] sm:$0xf] %v3461_v56  ;;  %v4216_v34 = vpop.f32.mrb[94].mxu1 }
 0x3f0   : > { %3602 = vst [vmem:[%s5889_s13 + $0xe4] sm:$0xf] %v3445_v16  ;;  %v4192_v38 = vpop.f32.mrb[110].mxu0  ;;  %v3464_v20 = vcombine.high %v4216_v34, %v4216_v34  ;;  %3639 = vst [vmem:[%s5889_s13 + $0x178] sm:$0xf] %v4216_v34  ;;  %v3264_v17 = vpop.f32.mrb[95].mxu1 }
 0x3f1   : > { %v3448_v0 = vcombine.high %v4192_v38, %v4192_v38  ;;  %3607 = vst [vmem:[%s5889_s13 + $0xf8] sm:$0xf] %v4192_v38  ;;  %v3184_v27 = vpop.f32.mrb[111].mxu0  ;;  %v3463_v63 = vcombine.high %v3264_v17, %v3264_v17  ;;  %3637 = vst [vmem:[%s5889_s13 + $0x170] sm:$0xf] %v3264_v17 }
 0x3f2   : > { %v3447_v58 = vcombine.high %v3184_v27, %v3184_v27  ;;  %3605 = vst [vmem:[%s5889_s13 + $0xf0] sm:$0xf] %v3184_v27  ;;  %3640 = vst [vmem:[%s5889_s13 + $0x17c] sm:$0xf] %v3464_v20 }
 0x3f3   : > { %3608 = vst [vmem:[%s5889_s13 + $0xfc] sm:$0xf] %v3448_v0  ;;  %3638 = vst [vmem:[%s5889_s13 + $0x174] sm:$0xf] %v3463_v63  ;;  %v4219_v18 = vpop.f32.mrb[96].mxu1 }
 0x3f4   : > { %3606 = vst [vmem:[%s5889_s13 + $0xf4] sm:$0xf] %v3447_v58  ;;  %v3466_v41 = vcombine.high %v4219_v18, %v4219_v18  ;;  %3643 = vst [vmem:[%s5889_s13 + $0x188] sm:$0xf] %v4219_v18  ;;  %v3274_v6 = vpop.f32.mrb[97].mxu1 }
 0x3f5   : > { %v3465_v62 = vcombine.high %v3274_v6, %v3274_v6  ;;  %3641 = vst [vmem:[%s5889_s13 + $0x180] sm:$0xf] %v3274_v6 }
 0x3f6   : > { %3644 = vst [vmem:[%s5889_s13 + $0x18c] sm:$0xf] %v3466_v41 }
 0x3f7   : > { %3642 = vst [vmem:[%s5889_s13 + $0x184] sm:$0xf] %v3465_v62  ;;  %v4222_v14 = vpop.f32.mrb[98].mxu1 }
 0x3f8   : > { %v3468_v13 = vcombine.high %v4222_v14, %v4222_v14  ;;  %3647 = vst [vmem:[%s5889_s13 + $0x198] sm:$0xf] %v4222_v14  ;;  %v3284_v9 = vpop.f32.mrb[99].mxu1 }
 0x3f9   : > { %v3467_v12 = vcombine.high %v3284_v9, %v3284_v9  ;;  %3645 = vst [vmem:[%s5889_s13 + $0x190] sm:$0xf] %v3284_v9 }
 0x3fa   : > { %3648 = vst [vmem:[%s5889_s13 + $0x19c] sm:$0xf] %v3468_v13 }
 0x3fb   : > { %3646 = vst [vmem:[%s5889_s13 + $0x194] sm:$0xf] %v3467_v12  ;;  %v4225_v19 = vpop.f32.mrb[100].mxu1 }
 0x3fc   : > { %v3470_v46 = vcombine.high %v4225_v19, %v4225_v19  ;;  %3651 = vst [vmem:[%s5889_s13 + $0x1a8] sm:$0xf] %v4225_v19  ;;  %v3294_v15 = vpop.f32.mrb[101].mxu1 }
 0x3fd   : > { %v3469_v25 = vcombine.high %v3294_v15, %v3294_v15  ;;  %3649 = vst [vmem:[%s5889_s13 + $0x1a0] sm:$0xf] %v3294_v15 }
 0x3fe   : > { %3652 = vst [vmem:[%s5889_s13 + $0x1ac] sm:$0xf] %v3470_v46 }
 0x3ff   : > { %3650 = vst [vmem:[%s5889_s13 + $0x1a4] sm:$0xf] %v3469_v25  ;;  %v4228_v49 = vpop.f32.mrb[102].mxu1 }
 0x400   : > { %v3472_v45 = vcombine.high %v4228_v49, %v4228_v49  ;;  %3655 = vst [vmem:[%s5889_s13 + $0x1b8] sm:$0xf] %v4228_v49  ;;  %v3304_v48 = vpop.f32.mrb[103].mxu1 }
 0x401   : > { %v3471_v22 = vcombine.high %v3304_v48, %v3304_v48  ;;  %3653 = vst [vmem:[%s5889_s13 + $0x1b0] sm:$0xf] %v3304_v48 }
 0x402   : > { %3656 = vst [vmem:[%s5889_s13 + $0x1bc] sm:$0xf] %v3472_v45 }
 0x403   : > { %3654 = vst [vmem:[%s5889_s13 + $0x1b4] sm:$0xf] %v3471_v22  ;;  %v4231_v39 = vpop.f32.mrb[104].mxu1 }
 0x404   : > { %v3474_v36 = vcombine.high %v4231_v39, %v4231_v39  ;;  %3659 = vst [vmem:[%s5889_s13 + $0x1c8] sm:$0xf] %v4231_v39  ;;  %v3314_v60 = vpop.f32.mrb[105].mxu1 }
 0x405   : > { %v3473_v32 = vcombine.high %v3314_v60, %v3314_v60  ;;  %3657 = vst [vmem:[%s5889_s13 + $0x1c0] sm:$0xf] %v3314_v60 }
 0x406   : > { %3660 = vst [vmem:[%s5889_s13 + $0x1cc] sm:$0xf] %v3474_v36 }
 0x407   : > { %3658 = vst [vmem:[%s5889_s13 + $0x1c4] sm:$0xf] %v3473_v32  ;;  %v4234_v30 = vpop.f32.mrb[106].mxu1 }
 0x408   : > { %v3476_v4 = vcombine.high %v4234_v30, %v4234_v30  ;;  %3663 = vst [vmem:[%s5889_s13 + $0x1d8] sm:$0xf] %v4234_v30  ;;  %v3324_v1 = vpop.f32.mrb[107].mxu1 }
 0x409   : > { %v3475_v61 = vcombine.high %v3324_v1, %v3324_v1  ;;  %3661 = vst [vmem:[%s5889_s13 + $0x1d0] sm:$0xf] %v3324_v1 }
 0x40a   : > { %3664 = vst [vmem:[%s5889_s13 + $0x1dc] sm:$0xf] %v3476_v4 }
 0x40b   : > { %3662 = vst [vmem:[%s5889_s13 + $0x1d4] sm:$0xf] %v3475_v61  ;;  %v4237_v26 = vpop.f32.mrb[108].mxu1 }
 0x40c   : > { %v3478_v51 = vcombine.high %v4237_v26, %v4237_v26  ;;  %3667 = vst [vmem:[%s5889_s13 + $0x1e8] sm:$0xf] %v4237_v26  ;;  %v3334_v24 = vpop.f32.mrb[109].mxu1 }
 0x40d   : > { %v3477_v44 = vcombine.high %v3334_v24, %v3334_v24  ;;  %3665 = vst [vmem:[%s5889_s13 + $0x1e0] sm:$0xf] %v3334_v24 }
 0x40e   : > { %3668 = vst [vmem:[%s5889_s13 + $0x1ec] sm:$0xf] %v3478_v51 }
 0x40f   : > { %3666 = vst [vmem:[%s5889_s13 + $0x1e4] sm:$0xf] %v3477_v44  ;;  %v4240_v43 = vpop.f32.mrb[110].mxu1 }
 0x410   : > { %v3480_v57 = vcombine.high %v4240_v43, %v4240_v43  ;;  %3671 = vst [vmem:[%s5889_s13 + $0x1f8] sm:$0xf] %v4240_v43  ;;  %v3344_v47 = vpop.f32.mrb[111].mxu1 }
 0x411   : > { %v3479_v59 = vcombine.high %v3344_v47, %v3344_v47  ;;  %3669 = vst [vmem:[%s5889_s13 + $0x1f0] sm:$0xf] %v3344_v47 }
 0x412   : > { %3672 = vst [vmem:[%s5889_s13 + $0x1fc] sm:$0xf] %v3480_v57 }
 0x413   : > { %3670 = vst [vmem:[%s5889_s13 + $0x1f4] sm:$0xf] %v3479_v59 }
 0x414 PF: > { %s18_s26 = sadd.s32 1, %s4483_s26   ;;  %s6059_s24 = smov %s4479_s25 }
 0x415   : > { %p15_p5 = scmp.ge.s32.totalorder %s18_s26, 4   ;;  %s6060_s25 = smov %s6062_s27 }
 0x417   :  { %17 = sbr.rel (!%p15_p5) target bundleno = 2 (0x2), region = 96 }

</bundles_post_ra>
